<compile_context>
chip_gen: v6e
topology: v6e:2x2x1
jax: 0.10.0
libtpu: 0.0.40
codegen_flags: <defaults>
</compile_context>

<pallas_src>
import functools

import jax
import jax.numpy as jnp
from jax import lax
from jax.experimental import pallas as pl
from jax.experimental.pallas import tpu as pltpu

EPS = 1e-5          # PyTorch BatchNorm2d default eps
LANE = 128


def _round_up(v, m):
    return (v + m - 1) // m * m


# ---------------------------------------------------------------------------
# Fused Pallas kernel
# ---------------------------------------------------------------------------
def _resblock_kernel(xs_ref, ws_ref, w1_ref, w2_ref, g1_ref, b1_ref,
                     g2_ref, b2_ref, p_ref, pt_ref, o_ref, halo_ref,
                     *, n, ho, inv_count):
    """Whole ResBlock on VMEM-resident halo-layout activations.

    xs_ref  : (N, Ho+2, Ls) bf16  space-to-depth input, zero halo rows/cols, lane-padded
    ws_ref  : (2, Ls, Lp)   bf16  scale-conv banded weights (row offsets dy=-1,0)
    w1/w2   : (3, Lp, Lp)   bf16  3x3 conv banded weights (dy=-1,0,+1)
    g1/g2   : (1, Lp) f32   gamma per channel (lanes [0,cout))
    b1/b2   : (1, Lp) f32   beta already expanded to lane layout (zero at halo/pad lanes)
    p_ref   : (Lp, Lp) f32  lane-layout -> per-channel reduce matrix
    pt_ref  : (Lp, Lp) f32  per-channel -> lane-layout expand matrix (zeroes halo/pad)
    o_ref   : (N*Ho, Lp) bf16 output, interior channels at lanes [cout, (Wo+1)*cout)
    halo_ref: (N, Ho+2, Lp) bf16 scratch, reused for residual then for relu(bn(conv1))
    """
    m = n * ho
    lp = o_ref.shape[1]
    p_mat = p_ref[...]            # hoisted: loaded once, reused by both BNs
    pt_mat = pt_ref[...]

    def conv(src_ref, w_ref, dys):
        """One full-lane matmul per row offset dy against a banded weight matrix."""
        acc = jnp.zeros((m, lp), jnp.float32)
        for i, dy in enumerate(dys):
            s = src_ref[:, 1 + dy: 1 + dy + ho, :]           # (N, Ho, L) bf16, zero halos
            acc = acc + jnp.dot(s.reshape(m, s.shape[-1]), w_ref[i],
                                preferred_element_type=jnp.float32)
        return acc

    def bn(y, g_ref, bfull_ref):
        """Two-pass BatchNorm; per-channel stats via tiny reduce/expand matmuls."""
        s1 = jnp.dot(jnp.sum(y, axis=0, keepdims=True), p_mat,
                     preferred_element_type=jnp.float32)
        mean_c = s1 * inv_count                              # per-channel mean
        mean_l = jnp.dot(mean_c, pt_mat, preferred_element_type=jnp.float32)
        d = y - mean_l                                       # halo lanes stay exactly 0
        s2 = jnp.dot(jnp.sum(d * d, axis=0, keepdims=True), p_mat,
                     preferred_element_type=jnp.float32)     # centered variance (>=0)
        scale_c = g_ref[...] * lax.rsqrt(s2 * inv_count + EPS)
        scale_l = jnp.dot(scale_c, pt_mat, preferred_element_type=jnp.float32)
        return d * scale_l + bfull_ref[...]                  # halo/pad lanes remain 0

    # zero-halo scratch: halo rows stay 0 for the whole kernel, only interior is written
    halo_ref[...] = jnp.zeros(halo_ref.shape, halo_ref.dtype)

    # residual = Conv3x3(stride=2, pad=1)(x)   -- 2 matmuls on the s2d grid
    residual = conv(xs_ref, ws_ref, (-1, 0))                 # (M, Lp) f32
    res_bf = residual.astype(jnp.bfloat16)
    halo_ref[:, 1:1 + ho, :] = res_bf.reshape(n, ho, lp)

    # y = ReLU(BN(Conv3x3(residual)))          -- 3 matmuls
    y = jnp.maximum(bn(conv(halo_ref, w1_ref, (-1, 0, 1)), g1_ref, b1_ref), 0.0)
    halo_ref[:, 1:1 + ho, :] = y.astype(jnp.bfloat16).reshape(n, ho, lp)

    # y = BN(Conv3x3(y))                       -- 3 matmuls
    y = bn(conv(halo_ref, w2_ref, (-1, 0, 1)), g2_ref, b2_ref)

    # out = ReLU(residual + y)
    o_ref[...] = jnp.maximum(res_bf.astype(jnp.float32) + y, 0.0).astype(o_ref.dtype)


# ---------------------------------------------------------------------------
# Host-side construction of banded weights / reduce-expand matrices (pure XLA)
# ---------------------------------------------------------------------------
def _banded_weights(taps, c_in, c_out, wo, l_in, l_out):
    """Band[(wh+dx)*c_in + ci, wh*c_out + co] = W_dx[ci, co] for interior wh in [1, Wo]."""
    band = jnp.zeros((l_in, l_out), jnp.float32)
    wh = jnp.arange(1, wo + 1)
    ci = jnp.arange(c_in)
    co = jnp.arange(c_out)
    for dx, wmat in taps:
        rows = (wh[:, None, None] + dx) * c_in + ci[None, :, None]     # (Wo, c_in, 1)
        cols = wh[:, None, None] * c_out + co[None, None, :]           # (Wo, 1, c_out)
        vals = jnp.broadcast_to(wmat.astype(jnp.float32)[None], (wo, c_in, c_out))
        band = band.at[rows, cols].set(vals)
    return band


def _conv3x3_bands(w, cout, wo, lp):
    """(3,3,cout,cout) HWIO -> (3, Lp, Lp) banded weights, row-offset order dy=-1,0,+1."""
    bands = []
    for ky in range(3):                              # dy = ky - 1
        taps = [(kx - 1, w[ky, kx]) for kx in range(3)]
        bands.append(_banded_weights(taps, cout, cout, wo, lp, lp))
    return jnp.stack(bands).astype(jnp.bfloat16)


def _scale_bands(w, cin, cout, wo, ls, lp):
    """Stride-2 3x3 conv -> 2x2 conv on the space-to-depth grid -> (2, Ls, Lp) bands."""
    cs = 4 * cin
    ws6 = jnp.zeros((2, 2, 2, 2, cin, cout), jnp.float32)    # (dyi, dxi, py, px, ci, co)
    for ky in range(3):
        for kx in range(3):
            dyi, py = (ky + 1) // 2, (ky + 1) % 2            # 2*dyi + py = ky + 1
            dxi, px = (kx + 1) // 2, (kx + 1) % 2
            ws6 = ws6.at[dyi, dxi, py, px].set(w[ky, kx])
    ws4 = ws6.reshape(2, 2, cs, cout)                        # s2d channel = (py*2+px)*cin+ci
    bands = []
    for dyi in range(2):                                     # dy = dyi - 1
        taps = [(dxi - 1, ws4[dyi, dxi]) for dxi in range(2)]
        bands.append(_banded_weights(taps, cs, cout, wo, ls, lp))
    return jnp.stack(bands).astype(jnp.bfloat16)


def _group_matrices(cout, wo, lp):
    """P: lane-layout -> per-channel sum.  P^T: per-channel -> lane layout (zeroes halo)."""
    wh = jnp.arange(1, wo + 1)
    co = jnp.arange(cout)
    rows = (wh[:, None] * cout + co[None, :]).reshape(-1)
    cols = jnp.tile(co, wo)
    p = jnp.zeros((lp, lp), jnp.float32).at[rows, cols].set(1.0)
    return p, p.T


def resblock_forward(x_nchw, params):
    """ResBlock('down', BatchNorm2d) forward.  Input/output: NCHW float32."""
    # NCHW<->NHWC transposes exist only for the PyTorch-facing API.
    x = jnp.transpose(x_nchw, (0, 2, 3, 1)).astype(jnp.float32)          # NHWC
    n, h, w, cin = x.shape
    assert h % 2 == 0 and w % 2 == 0, "stride-2 path assumes even H, W"
    ho, wo = h // 2, w // 2
    hh, whalo = ho + 2, wo + 2
    cout = params["w_scale"].shape[-1]
    cs = 4 * cin
    ls = _round_up(whalo * cs, LANE)
    lp = _round_up(whalo * cout, LANE)
    m = n * ho

    # space-to-depth (stride-2 3x3 conv == 2x2 conv on (Ho, Wo, 4*Cin)), halo embed,
    # lane pad, bf16.  Pure layout - no data duplication.
    xs = x.reshape(n, ho, 2, wo, 2, cin).transpose(0, 1, 3, 2, 4, 5).reshape(n, ho, wo, cs)
    xs = jnp.pad(xs, ((0, 0), (1, 1), (1, 1), (0, 0))).reshape(n, hh, whalo * cs)
    xs = jnp.pad(xs, ((0, 0), (0, 0), (0, ls - whalo * cs))).astype(jnp.bfloat16)

    # banded weights (dx shifts + left/right zero-pad folded into the weight matrix)
    ws_b = _scale_bands(params["w_scale"], cin, cout, wo, ls, lp)         # (2, Ls, Lp)
    w1_b = _conv3x3_bands(params["w1"], cout, wo, lp)                     # (3, Lp, Lp)
    w2_b = _conv3x3_bands(params["w2"], cout, wo, lp)

    # BN reduce/expand matrices and affine params
    p_mat, pt_mat = _group_matrices(cout, wo, lp)
    g1 = jnp.pad(params["g1"], (0, lp - cout)).reshape(1, lp).astype(jnp.float32)
    g2 = jnp.pad(params["g2"], (0, lp - cout)).reshape(1, lp).astype(jnp.float32)
    b1 = (jnp.pad(params["b1"], (0, lp - cout)).reshape(1, lp) @ pt_mat).astype(jnp.float32)
    b2 = (jnp.pad(params["b2"], (0, lp - cout)).reshape(1, lp) @ pt_mat).astype(jnp.float32)

    # conservative single-block working-set estimate (inputs + scratch + f32 temporaries)
    est = (2 * (xs.size + ws_b.size + w1_b.size + w2_b.size)
           + 4 * (p_mat.size + pt_mat.size)
           + 2 * n * hh * lp + 2 * m * lp
           + 6 * m * lp * 4)
    assert est < 24 * 1024 * 1024, "single-block working set too large; tile M (TODO)"

    kernel = functools.partial(_resblock_kernel, n=n, ho=ho,
                               inv_count=1.0 / float(n * ho * wo))
    out = pl.pallas_call(
        kernel,
        out_shape=jax.ShapeDtypeStruct((m, lp), jnp.bfloat16),
        in_specs=[pl.BlockSpec(memory_space=pltpu.MemorySpace.VMEM)] * 10,
        out_specs=pl.BlockSpec(memory_space=pltpu.MemorySpace.VMEM),
        scratch_shapes=[pltpu.VMEM((n, hh, lp), jnp.bfloat16)],
        compiler_params=pltpu.CompilerParams(vmem_limit_bytes=32 * 1024 * 1024),
    )(xs, ws_b, w1_b, w2_b, g1, b1, g2, b2, p_mat, pt_mat)

    # interior lanes are [cout, (Wo+1)*cout): strip halo columns, back to NCHW f32
    out = out[:, cout:cout + wo * cout].astype(jnp.float32)
    out = out.reshape(n, ho, wo, cout).transpose(0, 3, 1, 2)
    return out


# ---------------------------------------------------------------------------
# Pure-JAX f32 reference (PyTorch semantics) for correctness check
# ---------------------------------------------------------------------------
def _ref_forward(x_nchw, params):
    x = jnp.transpose(x_nchw, (0, 2, 3, 1)).astype(jnp.float32)

    def conv(v, w, stride):
        return lax.conv_general_dilated(
            v, w, (stride, stride), [(1, 1), (1, 1)],
            dimension_numbers=("NHWC", "HWIO", "NHWC"))

    def bn(y, g, b):
        mean = jnp.mean(y, axis=(0, 1, 2), keepdims=True)
        var = jnp.mean(jnp.square(y - mean), axis=(0, 1, 2), keepdims=True)
        return (y - mean) * lax.rsqrt(var + EPS) * g + b

    res = conv(x, params["w_scale"], 2)
    y = jnp.maximum(bn(conv(res, params["w1"], 1), params["g1"], params["b1"]), 0.0)
    y = bn(conv(y, params["w2"], 1), params["g2"], params["b2"])
    out = jnp.maximum(res + y, 0.0)
    return jnp.transpose(out, (0, 3, 1, 2))


# ---------------------------------------------------------------------------
if __name__ == "__main__":
    in_nc, out_nc = 4, 8
    N, H, W = 2, 16, 16

    key = jax.random.PRNGKey(0)
    kx, kws, kw1, kw2, kg1, kb1, kg2, kb2 = jax.random.split(key, 8)

    x = jax.random.normal(kx, (N, in_nc, H, W), dtype=jnp.float32)

    # Deterministic synthetic parameters (HWIO conv weights; bias-free convs,
    # BatchNorm affine params) matching a fresh ResBlock(4, 8, 'down', BatchNorm2d).
    params = {
        "w_scale": 0.1 * jax.random.normal(kws, (3, 3, in_nc, out_nc), jnp.float32),
        "w1":      0.1 * jax.random.normal(kw1, (3, 3, out_nc, out_nc), jnp.float32),
        "w2":      0.1 * jax.random.normal(kw2, (3, 3, out_nc, out_nc), jnp.float32),
        "g1": 1.0 + 0.1 * jax.random.normal(kg1, (out_nc,), jnp.float32),
        "b1":       0.1 * jax.random.normal(kb1, (out_nc,), jnp.float32),
        "g2": 1.0 + 0.1 * jax.random.normal(kg2, (out_nc,), jnp.float32),
        "b2":       0.1 * jax.random.normal(kb2, (out_nc,), jnp.float32),
    }

    out = jax.block_until_ready(jax.jit(resblock_forward)(x, params))
    ref = jax.block_until_ready(_ref_forward(x, params))

    assert out.shape == (N, out_nc, H // 2, W // 2), out.shape
    # bf16 MXU inputs, bf16 intermediates/output (f32 accumulation & BN math) vs. the
    # pure-f32 reference -> relaxed tolerance.
    assert jnp.allclose(out, ref, atol=4e-2, rtol=4e-2), float(jnp.abs(out - ref).max())

    print("KERNEL_OK")
</pallas_src>

<mosaic_0001>
module attributes {stable_mosaic.version = 11 : i64} {
  func.func @_resblock_kernel(%arg0: memref<2x10x256xbf16, #tpu.memory_space<vmem>>, %arg1: memref<2x256x128xbf16, #tpu.memory_space<vmem>>, %arg2: memref<3x128x128xbf16, #tpu.memory_space<vmem>>, %arg3: memref<3x128x128xbf16, #tpu.memory_space<vmem>>, %arg4: memref<1x128xf32, #tpu.memory_space<vmem>>, %arg5: memref<1x128xf32, #tpu.memory_space<vmem>>, %arg6: memref<1x128xf32, #tpu.memory_space<vmem>>, %arg7: memref<1x128xf32, #tpu.memory_space<vmem>>, %arg8: memref<128x128xf32, #tpu.memory_space<vmem>>, %arg9: memref<128x128xf32, #tpu.memory_space<vmem>>, %arg10: memref<16x128xbf16, #tpu.memory_space<vmem>>, %arg11: memref<2x10x128xbf16, #tpu.memory_space<vmem>>) attributes {dimension_semantics = [], scalar_prefetch = 0 : i64, scratch_operands = 1 : i64, tpu.core_type = #tpu.core_type<tc>} {
    %c0 = arith.constant 0 : index
    %c0_0 = arith.constant 0 : index
    %0 = vector.load %arg8[%c0, %c0_0] : memref<128x128xf32, #tpu.memory_space<vmem>>, vector<128x128xf32>
    %c0_1 = arith.constant 0 : index
    %c0_2 = arith.constant 0 : index
    %1 = vector.load %arg9[%c0_1, %c0_2] : memref<128x128xf32, #tpu.memory_space<vmem>>, vector<128x128xf32>
    %cst = arith.constant 0.000000e+00 : bf16
    %2 = vector.broadcast %cst : bf16 to vector<2x10x128xbf16>
    %c0_3 = arith.constant 0 : index
    %c0_4 = arith.constant 0 : index
    %c0_5 = arith.constant 0 : index
    %3 = vector.load %arg11[%c0_3, %c0_4, %c0_5] : memref<2x10x128xbf16, #tpu.memory_space<vmem>>, vector<2x10x128xbf16>
    tpu.vector_store %arg11[%c0_3, %c0_4, %c0_5], %2 {strides = array<i32>} : memref<2x10x128xbf16, #tpu.memory_space<vmem>>, vector<2x10x128xbf16>,
    %cst_6 = arith.constant 0.000000e+00 : f32
    %4 = vector.broadcast %cst_6 : f32 to vector<16x128xf32>
    %c0_7 = arith.constant 0 : index
    %c0_8 = arith.constant 0 : index
    %c0_9 = arith.constant 0 : index
    %5 = vector.load %arg0[%c0_7, %c0_8, %c0_9] : memref<2x10x256xbf16, #tpu.memory_space<vmem>>, vector<2x8x256xbf16>
    %6 = vector.shape_cast %5 : vector<2x8x256xbf16> to vector<16x256xbf16>
    %c0_10 = arith.constant 0 : index
    %c0_11 = arith.constant 0 : index
    %c0_12 = arith.constant 0 : index
    %7 = vector.load %arg1[%c0_10, %c0_11, %c0_12] : memref<2x256x128xbf16, #tpu.memory_space<vmem>>, vector<1x256x128xbf16>
    %8 = vector.shape_cast %7 : vector<1x256x128xbf16> to vector<256x128xbf16>
    %cst_13 = arith.constant dense<0.000000e+00> : vector<16x128xf32>
    %9 = tpu.matmul %6, %8, %cst_13 {dimension_numbers = #tpu.dot_dimension_numbers<[1], [0], [0], [1], [0, 0, 1, 1], [], []>} : vector<16x256xbf16>, vector<256x128xbf16>, vector<16x128xf32> -> vector<16x128xf32>
    %10 = arith.addf %4, %9 : vector<16x128xf32>
    %c0_14 = arith.constant 0 : index
    %c1 = arith.constant 1 : index
    %c0_15 = arith.constant 0 : index
    %11 = vector.load %arg0[%c0_14, %c1, %c0_15] : memref<2x10x256xbf16, #tpu.memory_space<vmem>>, vector<2x8x256xbf16>
    %12 = vector.shape_cast %11 : vector<2x8x256xbf16> to vector<16x256xbf16>
    %c1_16 = arith.constant 1 : index
    %c0_17 = arith.constant 0 : index
    %c0_18 = arith.constant 0 : index
    %13 = vector.load %arg1[%c1_16, %c0_17, %c0_18] : memref<2x256x128xbf16, #tpu.memory_space<vmem>>, vector<1x256x128xbf16>
    %14 = vector.shape_cast %13 : vector<1x256x128xbf16> to vector<256x128xbf16>
    %cst_19 = arith.constant dense<0.000000e+00> : vector<16x128xf32>
    %15 = tpu.matmul %12, %14, %cst_19 {dimension_numbers = #tpu.dot_dimension_numbers<[1], [0], [0], [1], [0, 0, 1, 1], [], []>} : vector<16x256xbf16>, vector<256x128xbf16>, vector<16x128xf32> -> vector<16x128xf32>
    %16 = arith.addf %10, %15 : vector<16x128xf32>
    %17 = arith.truncf %16 : vector<16x128xf32> to vector<16x128xbf16>
    %18 = vector.shape_cast %17 : vector<16x128xbf16> to vector<2x8x128xbf16>
    %c0_20 = arith.constant 0 : index
    %c1_21 = arith.constant 1 : index
    %c0_22 = arith.constant 0 : index
    %19 = vector.load %arg11[%c0_20, %c1_21, %c0_22] : memref<2x10x128xbf16, #tpu.memory_space<vmem>>, vector<2x8x128xbf16>
    tpu.vector_store %arg11[%c0_20, %c1_21, %c0_22], %18 {strides = array<i32>} : memref<2x10x128xbf16, #tpu.memory_space<vmem>>, vector<2x8x128xbf16>,
    %cst_23 = arith.constant 0.000000e+00 : f32
    %20 = vector.broadcast %cst_23 : f32 to vector<16x128xf32>
    %c0_24 = arith.constant 0 : index
    %c0_25 = arith.constant 0 : index
    %c0_26 = arith.constant 0 : index
    %21 = vector.load %arg11[%c0_24, %c0_25, %c0_26] : memref<2x10x128xbf16, #tpu.memory_space<vmem>>, vector<2x8x128xbf16>
    %22 = vector.shape_cast %21 : vector<2x8x128xbf16> to vector<16x128xbf16>
    %c0_27 = arith.constant 0 : index
    %c0_28 = arith.constant 0 : index
    %c0_29 = arith.constant 0 : index
    %23 = vector.load %arg2[%c0_27, %c0_28, %c0_29] : memref<3x128x128xbf16, #tpu.memory_space<vmem>>, vector<1x128x128xbf16>
    %24 = vector.shape_cast %23 : vector<1x128x128xbf16> to vector<128x128xbf16>
    %cst_30 = arith.constant dense<0.000000e+00> : vector<16x128xf32>
    %25 = tpu.matmul %22, %24, %cst_30 {dimension_numbers = #tpu.dot_dimension_numbers<[1], [0], [0], [1], [0, 0, 1, 1], [], []>} : vector<16x128xbf16>, vector<128x128xbf16>, vector<16x128xf32> -> vector<16x128xf32>
    %26 = arith.addf %20, %25 : vector<16x128xf32>
    %c0_31 = arith.constant 0 : index
    %c1_32 = arith.constant 1 : index
    %c0_33 = arith.constant 0 : index
    %27 = vector.load %arg11[%c0_31, %c1_32, %c0_33] : memref<2x10x128xbf16, #tpu.memory_space<vmem>>, vector<2x8x128xbf16>
    %28 = vector.shape_cast %27 : vector<2x8x128xbf16> to vector<16x128xbf16>
    %c1_34 = arith.constant 1 : index
    %c0_35 = arith.constant 0 : index
    %c0_36 = arith.constant 0 : index
    %29 = vector.load %arg2[%c1_34, %c0_35, %c0_36] : memref<3x128x128xbf16, #tpu.memory_space<vmem>>, vector<1x128x128xbf16>
    %30 = vector.shape_cast %29 : vector<1x128x128xbf16> to vector<128x128xbf16>
    %cst_37 = arith.constant dense<0.000000e+00> : vector<16x128xf32>
    %31 = tpu.matmul %28, %30, %cst_37 {dimension_numbers = #tpu.dot_dimension_numbers<[1], [0], [0], [1], [0, 0, 1, 1], [], []>} : vector<16x128xbf16>, vector<128x128xbf16>, vector<16x128xf32> -> vector<16x128xf32>
    %32 = arith.addf %26, %31 : vector<16x128xf32>
    %c0_38 = arith.constant 0 : index
    %c2 = arith.constant 2 : index
    %c0_39 = arith.constant 0 : index
    %33 = vector.load %arg11[%c0_38, %c2, %c0_39] : memref<2x10x128xbf16, #tpu.memory_space<vmem>>, vector<2x8x128xbf16>
    %34 = vector.shape_cast %33 : vector<2x8x128xbf16> to vector<16x128xbf16>
    %c2_40 = arith.constant 2 : index
    %c0_41 = arith.constant 0 : index
    %c0_42 = arith.constant 0 : index
    %35 = vector.load %arg2[%c2_40, %c0_41, %c0_42] : memref<3x128x128xbf16, #tpu.memory_space<vmem>>, vector<1x128x128xbf16>
    %36 = vector.shape_cast %35 : vector<1x128x128xbf16> to vector<128x128xbf16>
    %cst_43 = arith.constant dense<0.000000e+00> : vector<16x128xf32>
    %37 = tpu.matmul %34, %36, %cst_43 {dimension_numbers = #tpu.dot_dimension_numbers<[1], [0], [0], [1], [0, 0, 1, 1], [], []>} : vector<16x128xbf16>, vector<128x128xbf16>, vector<16x128xf32> -> vector<16x128xf32>
    %38 = arith.addf %32, %37 : vector<16x128xf32>
    %cst_44 = arith.constant dense<0.000000e+00> : vector<128xf32>
    %39 = vector.multi_reduction <add>, %38, %cst_44 [0] : vector<16x128xf32> to vector<128xf32>
    %40 = vector.shape_cast %39 : vector<128xf32> to vector<1x128xf32>
    %cst_45 = arith.constant dense<0.000000e+00> : vector<1x128xf32>
    %41 = tpu.matmul %40, %0, %cst_45 {dimension_numbers = #tpu.dot_dimension_numbers<[1], [0], [0], [1], [0, 0, 1, 1], [], []>} : vector<1x128xf32>, vector<128x128xf32>, vector<1x128xf32> -> vector<1x128xf32>
    %cst_46 = arith.constant 7.812500e-03 : f32
    %42 = vector.broadcast %cst_46 : f32 to vector<1x128xf32>
    %43 = arith.mulf %41, %42 : vector<1x128xf32>
    %cst_47 = arith.constant dense<0.000000e+00> : vector<1x128xf32>
    %44 = tpu.matmul %43, %1, %cst_47 {dimension_numbers = #tpu.dot_dimension_numbers<[1], [0], [0], [1], [0, 0, 1, 1], [], []>} : vector<1x128xf32>, vector<128x128xf32>, vector<1x128xf32> -> vector<1x128xf32>
    %45 = vector.broadcast %44 : vector<1x128xf32> to vector<16x128xf32>
    %46 = arith.subf %38, %45 : vector<16x128xf32>
    %47 = arith.mulf %46, %46 : vector<16x128xf32>
    %cst_48 = arith.constant dense<0.000000e+00> : vector<128xf32>
    %48 = vector.multi_reduction <add>, %47, %cst_48 [0] : vector<16x128xf32> to vector<128xf32>
    %49 = vector.shape_cast %48 : vector<128xf32> to vector<1x128xf32>
    %cst_49 = arith.constant dense<0.000000e+00> : vector<1x128xf32>
    %50 = tpu.matmul %49, %0, %cst_49 {dimension_numbers = #tpu.dot_dimension_numbers<[1], [0], [0], [1], [0, 0, 1, 1], [], []>} : vector<1x128xf32>, vector<128x128xf32>, vector<1x128xf32> -> vector<1x128xf32>
    %c0_50 = arith.constant 0 : index
    %c0_51 = arith.constant 0 : index
    %51 = vector.load %arg4[%c0_50, %c0_51] : memref<1x128xf32, #tpu.memory_space<vmem>>, vector<1x128xf32>
    %cst_52 = arith.constant 7.812500e-03 : f32
    %52 = vector.broadcast %cst_52 : f32 to vector<1x128xf32>
    %53 = arith.mulf %50, %52 : vector<1x128xf32>
    %cst_53 = arith.constant 9.99999974E-6 : f32
    %54 = vector.broadcast %cst_53 : f32 to vector<1x128xf32>
    %55 = arith.addf %53, %54 : vector<1x128xf32>
    %56 = math.rsqrt %55 : vector<1x128xf32>
    %57 = arith.mulf %51, %56 : vector<1x128xf32>
    %cst_54 = arith.constant dense<0.000000e+00> : vector<1x128xf32>
    %58 = tpu.matmul %57, %1, %cst_54 {dimension_numbers = #tpu.dot_dimension_numbers<[1], [0], [0], [1], [0, 0, 1, 1], [], []>} : vector<1x128xf32>, vector<128x128xf32>, vector<1x128xf32> -> vector<1x128xf32>
    %59 = vector.broadcast %58 : vector<1x128xf32> to vector<16x128xf32>
    %60 = arith.mulf %46, %59 : vector<16x128xf32>
    %c0_55 = arith.constant 0 : index
    %c0_56 = arith.constant 0 : index
    %61 = vector.load %arg5[%c0_55, %c0_56] : memref<1x128xf32, #tpu.memory_space<vmem>>, vector<1x128xf32>
    %62 = vector.broadcast %61 : vector<1x128xf32> to vector<16x128xf32>
    %63 = arith.addf %60, %62 : vector<16x128xf32>
    %cst_57 = arith.constant 0.000000e+00 : f32
    %64 = vector.broadcast %cst_57 : f32 to vector<16x128xf32>
    %65 = arith.maximumf %63, %64 : vector<16x128xf32>
    %66 = arith.truncf %65 : vector<16x128xf32> to vector<16x128xbf16>
    %67 = vector.shape_cast %66 : vector<16x128xbf16> to vector<2x8x128xbf16>
    %c0_58 = arith.constant 0 : index
    %c1_59 = arith.constant 1 : index
    %c0_60 = arith.constant 0 : index
    %68 = vector.load %arg11[%c0_58, %c1_59, %c0_60] : memref<2x10x128xbf16, #tpu.memory_space<vmem>>, vector<2x8x128xbf16>
    tpu.vector_store %arg11[%c0_58, %c1_59, %c0_60], %67 {strides = array<i32>} : memref<2x10x128xbf16, #tpu.memory_space<vmem>>, vector<2x8x128xbf16>,
    %cst_61 = arith.constant 0.000000e+00 : f32
    %69 = vector.broadcast %cst_61 : f32 to vector<16x128xf32>
    %c0_62 = arith.constant 0 : index
    %c0_63 = arith.constant 0 : index
    %c0_64 = arith.constant 0 : index
    %70 = vector.load %arg11[%c0_62, %c0_63, %c0_64] : memref<2x10x128xbf16, #tpu.memory_space<vmem>>, vector<2x8x128xbf16>
    %71 = vector.shape_cast %70 : vector<2x8x128xbf16> to vector<16x128xbf16>
    %c0_65 = arith.constant 0 : index
    %c0_66 = arith.constant 0 : index
    %c0_67 = arith.constant 0 : index
    %72 = vector.load %arg3[%c0_65, %c0_66, %c0_67] : memref<3x128x128xbf16, #tpu.memory_space<vmem>>, vector<1x128x128xbf16>
    %73 = vector.shape_cast %72 : vector<1x128x128xbf16> to vector<128x128xbf16>
    %cst_68 = arith.constant dense<0.000000e+00> : vector<16x128xf32>
    %74 = tpu.matmul %71, %73, %cst_68 {dimension_numbers = #tpu.dot_dimension_numbers<[1], [0], [0], [1], [0, 0, 1, 1], [], []>} : vector<16x128xbf16>, vector<128x128xbf16>, vector<16x128xf32> -> vector<16x128xf32>
    %75 = arith.addf %69, %74 : vector<16x128xf32>
    %c0_69 = arith.constant 0 : index
    %c1_70 = arith.constant 1 : index
    %c0_71 = arith.constant 0 : index
    %76 = vector.load %arg11[%c0_69, %c1_70, %c0_71] : memref<2x10x128xbf16, #tpu.memory_space<vmem>>, vector<2x8x128xbf16>
    %77 = vector.shape_cast %76 : vector<2x8x128xbf16> to vector<16x128xbf16>
    %c1_72 = arith.constant 1 : index
    %c0_73 = arith.constant 0 : index
    %c0_74 = arith.constant 0 : index
    %78 = vector.load %arg3[%c1_72, %c0_73, %c0_74] : memref<3x128x128xbf16, #tpu.memory_space<vmem>>, vector<1x128x128xbf16>
    %79 = vector.shape_cast %78 : vector<1x128x128xbf16> to vector<128x128xbf16>
    %cst_75 = arith.constant dense<0.000000e+00> : vector<16x128xf32>
    %80 = tpu.matmul %77, %79, %cst_75 {dimension_numbers = #tpu.dot_dimension_numbers<[1], [0], [0], [1], [0, 0, 1, 1], [], []>} : vector<16x128xbf16>, vector<128x128xbf16>, vector<16x128xf32> -> vector<16x128xf32>
    %81 = arith.addf %75, %80 : vector<16x128xf32>
    %c0_76 = arith.constant 0 : index
    %c2_77 = arith.constant 2 : index
    %c0_78 = arith.constant 0 : index
    %82 = vector.load %arg11[%c0_76, %c2_77, %c0_78] : memref<2x10x128xbf16, #tpu.memory_space<vmem>>, vector<2x8x128xbf16>
    %83 = vector.shape_cast %82 : vector<2x8x128xbf16> to vector<16x128xbf16>
    %c2_79 = arith.constant 2 : index
    %c0_80 = arith.constant 0 : index
    %c0_81 = arith.constant 0 : index
    %84 = vector.load %arg3[%c2_79, %c0_80, %c0_81] : memref<3x128x128xbf16, #tpu.memory_space<vmem>>, vector<1x128x128xbf16>
    %85 = vector.shape_cast %84 : vector<1x128x128xbf16> to vector<128x128xbf16>
    %cst_82 = arith.constant dense<0.000000e+00> : vector<16x128xf32>
    %86 = tpu.matmul %83, %85, %cst_82 {dimension_numbers = #tpu.dot_dimension_numbers<[1], [0], [0], [1], [0, 0, 1, 1], [], []>} : vector<16x128xbf16>, vector<128x128xbf16>, vector<16x128xf32> -> vector<16x128xf32>
    %87 = arith.addf %81, %86 : vector<16x128xf32>
    %cst_83 = arith.constant dense<0.000000e+00> : vector<128xf32>
    %88 = vector.multi_reduction <add>, %87, %cst_83 [0] : vector<16x128xf32> to vector<128xf32>
    %89 = vector.shape_cast %88 : vector<128xf32> to vector<1x128xf32>
    %cst_84 = arith.constant dense<0.000000e+00> : vector<1x128xf32>
    %90 = tpu.matmul %89, %0, %cst_84 {dimension_numbers = #tpu.dot_dimension_numbers<[1], [0], [0], [1], [0, 0, 1, 1], [], []>} : vector<1x128xf32>, vector<128x128xf32>, vector<1x128xf32> -> vector<1x128xf32>
    %cst_85 = arith.constant 7.812500e-03 : f32
    %91 = vector.broadcast %cst_85 : f32 to vector<1x128xf32>
    %92 = arith.mulf %90, %91 : vector<1x128xf32>
    %cst_86 = arith.constant dense<0.000000e+00> : vector<1x128xf32>
    %93 = tpu.matmul %92, %1, %cst_86 {dimension_numbers = #tpu.dot_dimension_numbers<[1], [0], [0], [1], [0, 0, 1, 1], [], []>} : vector<1x128xf32>, vector<128x128xf32>, vector<1x128xf32> -> vector<1x128xf32>
    %94 = vector.broadcast %93 : vector<1x128xf32> to vector<16x128xf32>
    %95 = arith.subf %87, %94 : vector<16x128xf32>
    %96 = arith.mulf %95, %95 : vector<16x128xf32>
    %cst_87 = arith.constant dense<0.000000e+00> : vector<128xf32>
    %97 = vector.multi_reduction <add>, %96, %cst_87 [0] : vector<16x128xf32> to vector<128xf32>
    %98 = vector.shape_cast %97 : vector<128xf32> to vector<1x128xf32>
    %cst_88 = arith.constant dense<0.000000e+00> : vector<1x128xf32>
    %99 = tpu.matmul %98, %0, %cst_88 {dimension_numbers = #tpu.dot_dimension_numbers<[1], [0], [0], [1], [0, 0, 1, 1], [], []>} : vector<1x128xf32>, vector<128x128xf32>, vector<1x128xf32> -> vector<1x128xf32>
    %c0_89 = arith.constant 0 : index
    %c0_90 = arith.constant 0 : index
    %100 = vector.load %arg6[%c0_89, %c0_90] : memref<1x128xf32, #tpu.memory_space<vmem>>, vector<1x128xf32>
    %cst_91 = arith.constant 7.812500e-03 : f32
    %101 = vector.broadcast %cst_91 : f32 to vector<1x128xf32>
    %102 = arith.mulf %99, %101 : vector<1x128xf32>
    %cst_92 = arith.constant 9.99999974E-6 : f32
    %103 = vector.broadcast %cst_92 : f32 to vector<1x128xf32>
    %104 = arith.addf %102, %103 : vector<1x128xf32>
    %105 = math.rsqrt %104 : vector<1x128xf32>
    %106 = arith.mulf %100, %105 : vector<1x128xf32>
    %cst_93 = arith.constant dense<0.000000e+00> : vector<1x128xf32>
    %107 = tpu.matmul %106, %1, %cst_93 {dimension_numbers = #tpu.dot_dimension_numbers<[1], [0], [0], [1], [0, 0, 1, 1], [], []>} : vector<1x128xf32>, vector<128x128xf32>, vector<1x128xf32> -> vector<1x128xf32>
    %108 = vector.broadcast %107 : vector<1x128xf32> to vector<16x128xf32>
    %109 = arith.mulf %95, %108 : vector<16x128xf32>
    %c0_94 = arith.constant 0 : index
    %c0_95 = arith.constant 0 : index
    %110 = vector.load %arg7[%c0_94, %c0_95] : memref<1x128xf32, #tpu.memory_space<vmem>>, vector<1x128xf32>
    %111 = vector.broadcast %110 : vector<1x128xf32> to vector<16x128xf32>
    %112 = arith.addf %109, %111 : vector<16x128xf32>
    %113 = arith.extf %17 : vector<16x128xbf16> to vector<16x128xf32>
    %114 = arith.addf %113, %112 : vector<16x128xf32>
    %cst_96 = arith.constant 0.000000e+00 : f32
    %115 = vector.broadcast %cst_96 : f32 to vector<16x128xf32>
    %116 = arith.maximumf %114, %115 : vector<16x128xf32>
    %117 = arith.truncf %116 : vector<16x128xf32> to vector<16x128xbf16>
    %c0_97 = arith.constant 0 : index
    %c0_98 = arith.constant 0 : index
    %118 = vector.load %arg10[%c0_97, %c0_98] : memref<16x128xbf16, #tpu.memory_space<vmem>>, vector<16x128xbf16>
    tpu.vector_store %arg10[%c0_97, %c0_98], %117 {strides = array<i32>} : memref<16x128xbf16, #tpu.memory_space<vmem>>, vector<16x128xbf16>,
    return
  }
}

</mosaic_0001>

<bundles_post_ra>
// kernel: resblock_forward.1
= control target key start
LH: loop header
LB: loop body
LE: loop exit
PB: predicated region body
PF: predicated region fallthrough
CT: control target
= control target key end

     0   :  { %vm108_vm0 = vsmask.f32 3328  ;;  %vm109_vm1 = vsmask.f32 7440  ;;  %v2908_v40 = vmov 0.0   ;;  %v2909_v62 = vmov 0   ;;  %s3829_s1 = inlined_call_operand.vmem [shape: bf16[2,256,128], index: 1, kind: input, shape index: {}]   ;;  %s3830_s0 = inlined_call_operand.vmem [shape: bf16[2,10,256], index: 0, kind: input, shape index: {}]   ;;  %s3831_s2 = inlined_call_operand.vmem [shape: bf16[3,128,128], index: 2, kind: input, shape index: {}]   ;;  %s3832_s8 = inlined_call_operand.vmem [shape: f32[128,128], index: 8, kind: input, shape index: {}]   ;;  %s3833_s9 = inlined_call_operand.vmem [shape: f32[128,128], index: 9, kind: input, shape index: {}]   ;;  %s3834_s3 = inlined_call_operand.vmem [shape: bf16[3,128,128], index: 3, kind: input, shape index: {}]   ;;  %s3835_s4 = inlined_call_operand.vmem [shape: f32[1,128], index: 4, kind: input, shape index: {}]   ;;  %s3836_s5 = inlined_call_operand.vmem [shape: f32[1,128], index: 5, kind: input, shape index: {}]   ;;  %s3837_s6 = inlined_call_operand.vmem [shape: f32[1,128], index: 6, kind: input, shape index: {}]   ;;  %s3838_s7 = inlined_call_operand.vmem [shape: f32[1,128], index: 7, kind: input, shape index: {}]   ;;  %s3839_s10 = inlined_call_operand.vmem [shape: bf16[16,128], index: 10, kind: output, shape index: {}]  }
   0x1   :  { %v2820_v0 = vld [vmem:[%s3829_s1 + $0xf8] sm:$0xff]   ;;  %v2824_v4 = vld [vmem:[%s3829_s1 + $0xf0] sm:$0xff]   ;;  %v2828_v8 = vld [vmem:[%s3829_s1 + $0xe8] sm:$0xff]   ;;  %68 = vst [vmem:[#allocation2] sm:$0xf] %v2909_v62  ;;  %vm2910_vm3 = vmmov 0  }
   0x2   :  { %v2821_v1 = vld [vmem:[%s3829_s1 + $0x78] sm:$0xff]   ;;  %2183 = vmatprep.subr.bf16.mxu0 %v2820_v0  ;;  %v2825_v5 = vld [vmem:[%s3829_s1 + $0x70] sm:$0xff]   ;;  %v2829_v9 = vld [vmem:[%s3829_s1 + $0x68] sm:$0xff]   ;;  %69 = vst [vmem:[#allocation2 + $0x4] sm:$0x1] %v2909_v62  ;;  %vm490_vm4 = vcmask 1043456  }
   0x3   :  { %v2822_v2 = vld [vmem:[%s3829_s1 + $0xb8] sm:$0xff]   ;;  %2205 = vmatprep.subr.bf16.mxu1 %v2821_v1  ;;  %v2826_v6 = vld [vmem:[%s3829_s1 + $0xb0] sm:$0xff]   ;;  %v2830_v10 = vld [vmem:[%s3829_s1 + $0xa8] sm:$0xff]   ;;  %70 = vst [vmem:[#allocation2 + $0x8] sm:$0xf] %v2909_v62  ;;  %vm496_vm6 = vcmask 1040384  }
   0x4   :  { %v2823_v3 = vld [vmem:[%s3829_s1 + $0x38] sm:$0xff]   ;;  %2184 = vmatpush3.bf16.msra.mxu0 %v2822_v2  ;;  %v2827_v7 = vld [vmem:[%s3829_s1 + $0x30] sm:$0xff]   ;;  %v2831_v11 = vld [vmem:[%s3829_s1 + $0x28] sm:$0xff]   ;;  %71 = vst [vmem:[#allocation2 + $0xc] sm:$0x1] %v2909_v62  ;;  %vm767_vm10 = vcmask 1042432  }
   0x5   :  { %2206 = vmatpush3.bf16.msra.mxu1 %v2823_v3  ;;  %2185 = vmatprep.subr.bf16.mxu0 %v2824_v4  ;;  %v2832_v12 = vld [vmem:[%s3829_s1 + $0xe0] sm:$0xff]   ;;  %v2836_v16 = vld [vmem:[%s3829_s1 + $0xd8] sm:$0xff]   ;;  %v2840_v20 = vld [vmem:[%s3829_s1 + $0xd0] sm:$0xff]   ;;  %vm491_vm5 = vsmask.f32 7938  ;;  %vm768_vm11 = vcmask 1046532  }
   0x6   :  { %2207 = vmatprep.subr.bf16.mxu1 %v2825_v5  ;;  %v2833_v13 = vld [vmem:[%s3829_s1 + $0x60] sm:$0xff]   ;;  %v2837_v17 = vld [vmem:[%s3829_s1 + $0x58] sm:$0xff]   ;;  %v2841_v21 = vld [vmem:[%s3829_s1 + $0x50] sm:$0xff]   ;;  %vm497_vm7 = vsmask.f32 256 }
   0x7   :  { %v2834_v14 = vld [vmem:[%s3829_s1 + $0xa0] sm:$0xff]   ;;  %v2838_v18 = vld [vmem:[%s3829_s1 + $0x98] sm:$0xff]   ;;  %v2842_v22 = vld [vmem:[%s3829_s1 + $0x90] sm:$0xff]  }
   0x8   :  { %2186 = vmatpush3.bf16.msra.mxu0 %v2826_v6  ;;  %v2835_v15 = vld [vmem:[%s3829_s1 + $0x20] sm:$0xff]   ;;  %v2839_v19 = vld [vmem:[%s3829_s1 + $0x18] sm:$0xff]   ;;  %v2843_v23 = vld [vmem:[%s3829_s1 + $0x10] sm:$0xff]  }
   0x9   :  { %2208 = vmatpush3.bf16.msra.mxu1 %v2827_v7  ;;  %2187 = vmatprep.subr.bf16.mxu0 %v2828_v8  ;;  %v2844_v24 = vld [vmem:[%s3829_s1 + $0xc8] sm:$0xff]   ;;  %v2848_v28 = vld [vmem:[%s3829_s1 + $0xc0] sm:$0xff]   ;;  %v73_v33 = vld [vmem:[%s3830_s0 + $0x10] sm:$0xff] }
   0xa   :  { %2209 = vmatprep.subr.bf16.mxu1 %v2829_v9  ;;  %v2845_v25 = vld [vmem:[%s3829_s1 + $0x48] sm:$0xff]   ;;  %v2849_v29 = vld [vmem:[%s3829_s1 + $0x40] sm:$0xff]   ;;  %v107_v35 = vld [vmem:[%s3830_s0 + $0x18] sm:$0x11]  ;;  %v126_v39 = vshrl.u32 %v73_v33, 16  ;;  %v129_v41 = vshll.u32 %v73_v33, 16 }
   0xb   :  { %v2846_v26 = vld [vmem:[%s3829_s1 + $0x88] sm:$0xff]   ;;  %v2850_v30 = vld [vmem:[%s3829_s1 + $0x80] sm:$0xff]   ;;  %v135_v42 = vshll.u32 %v107_v35, 16  ;;  %v2854_v49 = vld [vmem:[%s3831_s2 + $0x38] sm:$0xff]  }
   0xc   :  { %2188 = vmatpush3.bf16.msra.mxu0 %v2830_v10  ;;  %v2847_v27 = vld [vmem:[%s3829_s1 + $0x8] sm:$0xff]   ;;  %v2851_v31 = vld [vmem:[%s3829_s1] sm:$0xff]   ;;  %v128_v48 = vrot.slane %v126_v39, 4  ;;  %vm3081_vm2 = vmor %vm108_vm0, %vm109_vm1  ;;  %v131_v51 = vrot.slane %v129_v41, 5 }
   0xd   :  { %2210 = vmatpush3.bf16.msra.mxu1 %v2831_v11  ;;  %2189 = vmatprep.subr.bf16.mxu0 %v2832_v12  ;;  %v72_v32 = vld [vmem:[%s3830_s0] sm:$0xff]  ;;  %v106_v34 = vld [vmem:[%s3830_s0 + $0x8] sm:$0x11]  ;;  %v137_v52 = vrot.slane %v135_v42, 5  ;;  %v2855_v61 = vld [vmem:[%s3831_s2 + $0x30] sm:$0xff]  }
   0xe   :  { %2211 = vmatprep.subr.bf16.mxu1 %v2833_v13  ;;  %v112_v36 = vshrl.u32 %v72_v32, 16  ;;  %v115_v37 = vshll.u32 %v72_v32, 16  ;;  %v121_v38 = vshll.u32 %v106_v34, 16  ;;  %v2025_v43 = vcombine.high %v72_v32, %v73_v33  ;;  %v2856_v63 = vld [vmem:[%s3831_s2 + $0x78] sm:$0xff]   ;;  %v2857_v0 = vld [vmem:[%s3831_s2 + $0x28] sm:$0xff]   ;;  %v2858_v1 = vld [vmem:[%s3831_s2 + $0x70] sm:$0xff]  }
   0xf   :  { %v2024_v44 = vcombine.low %v72_v32, %v73_v33  ;;  %v132_v54 = vor.u32 %v131_v51, %v128_v48  ;;  %v2859_v2 = vld [vmem:[%s3831_s2 + $0x20] sm:$0xff]   ;;  %v2860_v3 = vld [vmem:[%s3831_s2 + $0x68] sm:$0xff]   ;;  %v2861_v4 = vld [vmem:[%s3831_s2 + $0x18] sm:$0xff]  }
  0x10   :  { %2190 = vmatpush3.bf16.msra.mxu0 %v2834_v14  ;;  %v114_v45 = vrot.slane %v112_v36, 4  ;;  %v117_v46 = vrot.slane %v115_v37, 5  ;;  %v123_v47 = vrot.slane %v121_v38, 5  ;;  %455 = vmatprep.mubr.bf16.mxu1 %v2025_v43  ;;  %v2862_v5 = vld [vmem:[%s3831_s2 + $0x60] sm:$0xff]   ;;  %v2863_v6 = vld [vmem:[%s3831_s2 + $0x10] sm:$0xff]   ;;  %v2864_v7 = vld [vmem:[%s3831_s2 + $0x58] sm:$0xff]  }
  0x11   :  { %2212 = vmatpush3.bf16.msra.mxu1 %v2835_v15  ;;  %2191 = vmatprep.subr.bf16.mxu0 %v2836_v16  ;;  %v133_v56 = vrot.slane %v132_v54, 4  ;;  %v2865_v8 = vld [vmem:[%s3831_s2 + $0x8] sm:$0xff]   ;;  %v2866_v9 = vld [vmem:[%s3831_s2 + $0x50] sm:$0xff]   ;;  %v2867_v10 = vld [vmem:[%s3831_s2] sm:$0xff]  }
  0x12   :  { %2213 = vmatprep.subr.bf16.mxu1 %v2837_v17  ;;  %v118_v53 = vor.u32 %v117_v46, %v114_v45  ;;  %v2869_v11 = vld [vmem:[%s3831_s2 + $0x48] sm:$0xff]   ;;  %v2870_v12 = vld [vmem:[%s3831_s2 + $0x40] sm:$0xff]   ;;  %vm3154_vm8 = vmand %vm490_vm4, %vm491_vm5 }
  0x13   :  { %v138_v58 = vsel %vm3081_vm2, %v133_v56, %v137_v52  ;;  %v493_v34 = vld [vmem:[#allocation2] sm:$0xf]  ;;  %vm3160_vm9 = vmand %vm496_vm6, %vm497_vm7  ;;  %v499_v36 = vld [vmem:[#allocation2 + $0x4] sm:$0x1] }
  0x14   :  { %2192 = vmatpush3.bf16.msra.mxu0 %v2838_v18  ;;  %v119_v55 = vrot.slane %v118_v53, 4  ;;  %v502_v45 = vld [vmem:[#allocation2 + $0x8] sm:$0xf]  ;;  %v505_v46 = vld [vmem:[#allocation2 + $0xc] sm:$0x1]  ;;  %vm3216_vm12 = vmor %vm767_vm10, %vm768_vm11 }
  0x15   :  { %2214 = vmatpush3.bf16.msra.mxu1 %v2839_v19  ;;  %2193 = vmatprep.subr.bf16.mxu0 %v2840_v20  ;;  %v2897_v50 = vld [vmem:[%s3834_s3 + $0xb0] sm:$0xff]  }
  0x16   :  { %2215 = vmatprep.subr.bf16.mxu1 %v2841_v21  ;;  %v124_v57 = vsel %vm3081_vm2, %v119_v55, %v123_v47 }
  0x17   :  { %v2006_v59 = vcombine.low %v124_v57, %v138_v58  ;;  %v2007_v60 = vcombine.high %v124_v57, %v138_v58 }
  0x18   :  { %2194 = vmatpush3.bf16.msra.mxu0 %v2842_v22 }
  0x19   :  { %2216 = vmatpush3.bf16.msra.mxu1 %v2843_v23  ;;  %2195 = vmatprep.subr.bf16.mxu0 %v2844_v24 }
  0x1a   :  { %2217 = vmatprep.subr.bf16.mxu1 %v2845_v25  ;;  %308 = vmatprep.mubr.bf16.mxu0 %v2007_v60 }
  0x1c   :  { %2196 = vmatpush3.bf16.msra.mxu0 %v2846_v26 }
  0x1d   :  { %2218 = vmatpush3.bf16.msra.mxu1 %v2847_v27  ;;  %2197 = vmatprep.subr.bf16.mxu0 %v2848_v28 }
  0x1e   :  { %2219 = vmatprep.subr.bf16.mxu1 %v2849_v29 }
  0x20   :  { %2198 = vmatpush3.bf16.msra.mxu0 %v2850_v30 }
  0x21   :  { %2220 = vmatpush3.bf16.msra.mxu1 %v2851_v31  ;;  %2417 = vmatprep.subr.bf16.mxu0 %v2908_v40 }
  0x22   :  { %2437 = vmatprep.subr.bf16.mxu1 %v2908_v40 }
  0x23   :  { %309 = vmatmul.mubr.bf16.vlgmr.msra.gmra.mxu0 %v2006_v59 }
  0x24   :  { %456 = vmatmul.mubr.bf16.vlgmr.msra.gmra.mxu1 %v2024_v44  ;;  %2418 = vmatpush3.bf16.msra.mxu0 %v2856_v63 }
  0x25   :  { %2438 = vmatpush3.bf16.msra.mxu1 %v2854_v49  ;;  %2419 = vmatprep.subr.bf16.mxu0 %v2908_v40 }
  0x26   :  { %2439 = vmatprep.subr.bf16.mxu1 %v2908_v40  ;;  %2453 = vmatprep.mubr.msk.bf16.mxu1 %vm2910_vm3, %v2908_v40 }
  0x27   :  { %2433 = vmatprep.mubr.msk.bf16.mxu0 %vm2910_vm3, %v2908_v40 }
  0x28   :  { %2420 = vmatpush3.bf16.msra.mxu0 %v2858_v1 }
  0x29   :  { %2440 = vmatpush3.bf16.msra.mxu1 %v2855_v61  ;;  %2421 = vmatprep.subr.bf16.mxu0 %v2908_v40 }
  0x2a   :  { %2441 = vmatprep.subr.bf16.mxu1 %v2908_v40 }
  0x2c   :  { %2422 = vmatpush3.bf16.msra.mxu0 %v2860_v3 }
  0x2d   :  { %2442 = vmatpush3.bf16.msra.mxu1 %v2857_v0  ;;  %2423 = vmatprep.subr.bf16.mxu0 %v2908_v40 }
  0x2e   :  { %2443 = vmatprep.subr.bf16.mxu1 %v2908_v40 }
  0x30   :  { %2424 = vmatpush3.bf16.msra.mxu0 %v2862_v5 }
  0x31   :  { %2444 = vmatpush3.bf16.msra.mxu1 %v2859_v2  ;;  %2425 = vmatprep.subr.bf16.mxu0 %v2908_v40 }
  0x32   :  { %2445 = vmatprep.subr.bf16.mxu1 %v2908_v40 }
  0x34   :  { %2426 = vmatpush3.bf16.msra.mxu0 %v2864_v7 }
  0x35   :  { %2446 = vmatpush3.bf16.msra.mxu1 %v2861_v4  ;;  %2427 = vmatprep.subr.bf16.mxu0 %v2908_v40 }
  0x36   :  { %2447 = vmatprep.subr.bf16.mxu1 %v2908_v40 }
  0x38   :  { %2428 = vmatpush3.bf16.msra.mxu0 %v2866_v9 }
  0x39   :  { %2448 = vmatpush3.bf16.msra.mxu1 %v2863_v6  ;;  %2429 = vmatprep.subr.bf16.mxu0 %v2908_v40 }
  0x3a   :  { %2449 = vmatprep.subr.bf16.mxu1 %v2908_v40 }
  0x3c   :  { %2430 = vmatpush3.bf16.msra.mxu0 %v2869_v11  ;;  %v2871_v11 = vld [vmem:[%s3831_s2 + $0xb8] sm:$0xff]  }
  0x3d   :  { %2450 = vmatpush3.bf16.msra.mxu1 %v2865_v8  ;;  %2431 = vmatprep.subr.bf16.mxu0 %v2908_v40 }
  0x3e   :  { %2451 = vmatprep.subr.bf16.mxu1 %v2908_v40 }
  0x40   :  { %2432 = vmatpush3.bf16.msra.mxu0 %v2870_v12 }
  0x41   :  { %2452 = vmatpush3.bf16.msra.mxu1 %v2867_v10  ;;  %2457 = vmatprep.subr.bf16.mxu0 %v2908_v40 }
  0x42   :  { %2477 = vmatprep.subr.mxu1 %v2908_v40 }
  0xe3   :  { %v2199_v16 = vpop.f32.mrf.mxu0 }
  0xe4   :  { %v2221_v13 = vpop.f32.mrf.mxu1 }
  0xe5   :  { %v2200_v18 = vpop.f32.mrf.mxu0 }
  0xe6   :  { %v2222_v14 = vpop.f32.mrf.mxu1  ;;  %v2201_v20 = vadd.f32 %v2200_v18, %v2199_v16  ;;  %v2875_v16 = vld [vmem:[%s3831_s2 + $0x98] sm:$0xff]  }
  0xe7   :  { %v2223_v17 = vadd.f32 %v2222_v14, %v2221_v13  ;;  %v2202_v21 = vpop.f32.mrf.mxu0  ;;  %v2872_v13 = vld [vmem:[%s3831_s2 + $0xb0] sm:$0xff]   ;;  %v2873_v14 = vld [vmem:[%s3831_s2 + $0xa8] sm:$0xff]  }
  0xe8   :  { %v2224_v15 = vpop.f32.mrf.mxu1 }
  0xe9   :  { %v458_v22 = vadd.f32 %v2223_v17, %v2201_v20  ;;  %v2203_v24 = vpop.f32.mrf.mxu0  ;;  %v2876_v17 = vld [vmem:[%s3831_s2 + $0x90] sm:$0xff]  }
  0xea   :  { %v2225_v19 = vpop.f32.mrf.mxu1  ;;  %v2204_v26 = vadd.f32 %v2203_v24, %v2202_v21 }
  0xeb   :  { %v2226_v23 = vadd.f32 %v2225_v19, %v2224_v15  ;;  %v2172_v25 = vpack.c.bf16 %v458_v22, %v458_v22  ;;  %v2874_v15 = vld [vmem:[%s3831_s2 + $0xa0] sm:$0xff]   ;;  %v2877_v19 = vld [vmem:[%s3831_s2 + $0x88] sm:$0xff]  }
  0xed   :  { %v471_v27 = vshrl.u32 %v2172_v25, 16  ;;  %v461_v28 = vadd.f32 %v2226_v23, %v2204_v26  ;;  %v474_v30 = vshll.u32 %v2172_v25, 16  ;;  %v2878_v23 = vld [vmem:[%s3831_s2 + $0x80] sm:$0xff]  }
  0xef   :  { %v473_v29 = vrot.slane %v471_v27, 7  ;;  %v3158_v32 = vpack.c.bf16 %v461_v28, %v458_v22  ;;  %v2173_v33 = vpack.c.bf16 %v461_v28, %v461_v28 }
  0xf1   :  { %v476_v37 = vor.u32 %v474_v30, %v473_v29  ;;  %v477_v38 = vrot.slane %v473_v29, 4  ;;  %v479_v39 = vshrl.u32 %v2173_v33, 16  ;;  %v482_v44 = vshll.u32 %v2173_v33, 16  ;;  %v3230_v30 = vld [vmem:[%s3832_s8 + $0x78] sm:$0xff]  ;;  %v3235_v33 = vld [vmem:[%s3832_s8 + $0x70] sm:$0xff] }
  0xf3   :  { %v494_v41 = vsel %vm3154_vm8, %v476_v37, %v493_v34  ;;  %v500_v42 = vsel %vm3160_vm9, %v477_v38, %v499_v36  ;;  %v481_v43 = vrot.slane %v479_v39, 7  ;;  %v3242_v34 = vld [vmem:[%s3832_s8 + $0x68] sm:$0xff]  ;;  %v3249_v36 = vld [vmem:[%s3832_s8 + $0x60] sm:$0xff]  ;;  %v3256_v37 = vld [vmem:[%s3832_s8 + $0x58] sm:$0xff] }
  0xf4   :  { %495 = vst [vmem:[#allocation2] sm:$0xf] %v494_v41  ;;  %501 = vst [vmem:[#allocation2 + $0x4] sm:$0x1] %v500_v42  ;;  %v3265_v38 = vld [vmem:[%s3832_s8 + $0x50] sm:$0xff]  ;;  %v3272_v39 = vld [vmem:[%s3832_s8 + $0x48] sm:$0xff] }
  0xf5   :  { %v484_v47 = vor.u32 %v482_v44, %v481_v43  ;;  %v485_v48 = vrot.slane %v481_v43, 4  ;;  %v3279_v41 = vld [vmem:[%s3832_s8 + $0x40] sm:$0xff]  ;;  %v3286_v42 = vld [vmem:[%s3832_s8 + $0x38] sm:$0xff]  ;;  %v3293_v43 = vld [vmem:[%s3832_s8 + $0x30] sm:$0xff] }
  0xf6   :  { %v3300_v44 = vld [vmem:[%s3832_s8 + $0x28] sm:$0xff] }
  0xf7   :  { %v503_v49 = vsel %vm3154_vm8, %v484_v47, %v502_v45  ;;  %v506_v51 = vsel %vm3160_vm9, %v485_v48, %v505_v46  ;;  %v3307_v45 = vld [vmem:[%s3832_s8 + $0x20] sm:$0xff]  ;;  %v3314_v46 = vld [vmem:[%s3832_s8 + $0x18] sm:$0xff]  ;;  %v3321_v47 = vld [vmem:[%s3832_s8 + $0x10] sm:$0xff] }
  0xf8   :  { %504 = vst [vmem:[#allocation2 + $0x8] sm:$0xf] %v503_v49  ;;  %507 = vst [vmem:[#allocation2 + $0xc] sm:$0x1] %v506_v51  ;;  %v3328_v48 = vld [vmem:[%s3832_s8 + $0x8] sm:$0xff]  ;;  %v3333_v49 = vld [vmem:[%s3832_s8] sm:$0xff] }
  0xf9   :  { %v3342_v51 = vld [vmem:[%s3833_s9 + $0x78] sm:$0xff] }
  0xfb   :  { %v3172_v52 = vld [vmem:[#allocation2] sm:$0xf]  ;;  %v526_v58 = vld [vmem:[#allocation2 + $0x4] sm:$0x1] }
  0xfc   :  { %v529_v53 = vshrl.u32 %v3172_v52, 16  ;;  %v532_v54 = vshll.u32 %v3172_v52, 16  ;;  %v538_v0 = vshll.u32 %v526_v58, 16  ;;  %v761_v20 = vld [vmem:[#allocation2] sm:$0xe]  ;;  %v772_v25 = vrot.slane %v526_v58, 5 }
  0xfd   :  { %v2078_v24 = vrot.slane %v761_v20, 9  ;;  %v3382_v58 = vld [vmem:[%s3833_s9 + $0x48] sm:$0xff] }
  0xfe   :  { %v531_v55 = vrot.slane %v529_v53, 4  ;;  %v534_v56 = vrot.slane %v532_v54, 5  ;;  %v540_v6 = vrot.slane %v538_v0, 5  ;;  %v3347_v53 = vld [vmem:[%s3833_s9 + $0x70] sm:$0xff]  ;;  %v3354_v54 = vld [vmem:[%s3833_s9 + $0x68] sm:$0xff]  ;;  %v3424_v0 = vld [vmem:[%s3833_s9 + $0x18] sm:$0xff] }
  0xff   :  { %v509_v57 = vld [vmem:[#allocation2 + $0x8] sm:$0xf]  ;;  %v527_v59 = vld [vmem:[#allocation2 + $0xc] sm:$0x1]  ;;  %v773_v28 = vsel %vm3216_vm12, %v2078_v24, %v772_v25 }
 0x100   :  { %v543_v60 = vshrl.u32 %v509_v57, 16  ;;  %v546_v61 = vshll.u32 %v509_v57, 16  ;;  %v2069_v62 = vcombine.low %v3172_v52, %v509_v57  ;;  %v535_v63 = vor.u32 %v534_v56, %v531_v55  ;;  %v762_v18 = vld [vmem:[#allocation2 + $0x8] sm:$0xe]  ;;  %v3361_v55 = vld [vmem:[%s3833_s9 + $0x60] sm:$0xff]  ;;  %v3368_v56 = vld [vmem:[%s3833_s9 + $0x58] sm:$0xff] }
 0x101   :  { %v552_v3 = vshll.u32 %v527_v59, 16  ;;  %v2079_v21 = vrot.slane %v762_v18, 9  ;;  %v776_v22 = vrot.slane %v527_v59, 5  ;;  %v3375_v57 = vld [vmem:[%s3833_s9 + $0x50] sm:$0xff]  ;;  %v3389_v59 = vld [vmem:[%s3833_s9 + $0x40] sm:$0xff]  ;;  %v3480_v25 = vld [vmem:[%s3833_s9 + $0x8] sm:$0xff] }
 0x102   :  { %2454 = vmatmul.mubr.bf16.vlgmr.msra.gmra.mxu1 %v2069_v62  ;;  %v545_v1 = vrot.slane %v543_v60, 4  ;;  %v548_v2 = vrot.slane %v546_v61, 5  ;;  %v536_v4 = vrot.slane %v535_v63, 4  ;;  %v3396_v60 = vld [vmem:[%s3833_s9 + $0x38] sm:$0xff]  ;;  %v3403_v61 = vld [vmem:[%s3833_s9 + $0x30] sm:$0xff]  ;;  %v3410_v62 = vld [vmem:[%s3833_s9 + $0x28] sm:$0xff] }
 0x103   :  { %2509 = vmatprep.mubr.msk.f32.mxu1 %vm2910_vm3, %v2908_v40  ;;  %v554_v8 = vrot.slane %v552_v3, 5  ;;  %v777_v27 = vsel %vm3216_vm12, %v2079_v21, %v776_v22  ;;  %2478 = vmatpush3.msra.mxu1 %v3230_v30  ;;  %v3417_v63 = vld [vmem:[%s3833_s9 + $0x20] sm:$0xff] }
 0x104   :  { %v549_v5 = vor.u32 %v548_v2, %v545_v1  ;;  %v541_v9 = vsel %vm3081_vm2, %v536_v4, %v540_v6  ;;  %v2096_v29 = vcombine.low %v773_v28, %v777_v27  ;;  %2479 = vmatprep.subr.mxu1 %v2908_v40  ;;  %v3431_v1 = vld [vmem:[%s3833_s9 + $0x10] sm:$0xff]  ;;  %v3487_v27 = vld [vmem:[%s3833_s9] sm:$0xff] }
 0x105   :  { %2480 = vmatpush3.msra.mxu1 %v3235_v33 }
 0x106   :  { %v550_v7 = vrot.slane %v549_v5, 4  ;;  %2481 = vmatprep.subr.mxu1 %v2908_v40 }
 0x107   :  { %2482 = vmatpush3.msra.mxu1 %v3242_v34 }
 0x108   :  { %v555_v10 = vsel %vm3081_vm2, %v550_v7, %v554_v8  ;;  %2483 = vmatprep.subr.mxu1 %v2908_v40 }
 0x109   :  { %v2060_v12 = vcombine.low %v541_v9, %v555_v10  ;;  %2484 = vmatpush3.msra.mxu1 %v3249_v36 }
 0x10a   :  { %2485 = vmatprep.subr.mxu1 %v2908_v40 }
 0x10b   :  { %2434 = vmatmul.mubr.bf16.vlgmr.msra.gmra.mxu0 %v2060_v12  ;;  %2486 = vmatpush3.msra.mxu1 %v3256_v37 }
 0x10c   :  { %2458 = vmatpush3.bf16.msra.mxu0 %v2871_v11  ;;  %2473 = vmatprep.mubr.msk.bf16.mxu0 %vm2910_vm3, %v2908_v40 }
 0x10d   :  { %2459 = vmatprep.subr.bf16.mxu0 %v2908_v40  ;;  %2487 = vmatprep.subr.mxu1 %v2908_v40 }
 0x10e   :  { %2488 = vmatpush3.msra.mxu1 %v3265_v38 }
 0x10f   :  { %2489 = vmatprep.subr.mxu1 %v2908_v40 }
 0x110   :  { %2460 = vmatpush3.bf16.msra.mxu0 %v2872_v13  ;;  %2490 = vmatpush3.msra.mxu1 %v3272_v39 }
 0x111   :  { %2461 = vmatprep.subr.bf16.mxu0 %v2908_v40  ;;  %2491 = vmatprep.subr.mxu1 %v2908_v40 }
 0x112   :  { %2492 = vmatpush3.msra.mxu1 %v3279_v41 }
 0x113   :  { %2493 = vmatprep.subr.mxu1 %v2908_v40 }
 0x114   :  { %2462 = vmatpush3.bf16.msra.mxu0 %v2873_v14  ;;  %2494 = vmatpush3.msra.mxu1 %v3286_v42 }
 0x115   :  { %2463 = vmatprep.subr.bf16.mxu0 %v2908_v40  ;;  %2495 = vmatprep.subr.mxu1 %v2908_v40 }
 0x116   :  { %2496 = vmatpush3.msra.mxu1 %v3293_v43 }
 0x117   :  { %2497 = vmatprep.subr.mxu1 %v2908_v40 }
 0x118   :  { %2464 = vmatpush3.bf16.msra.mxu0 %v2874_v15  ;;  %2498 = vmatpush3.msra.mxu1 %v3300_v44 }
 0x119   :  { %2465 = vmatprep.subr.bf16.mxu0 %v2908_v40  ;;  %2499 = vmatprep.subr.mxu1 %v2908_v40 }
 0x11a   :  { %2500 = vmatpush3.msra.mxu1 %v3307_v45 }
 0x11b   :  { %2501 = vmatprep.subr.mxu1 %v2908_v40 }
 0x11c   :  { %2466 = vmatpush3.bf16.msra.mxu0 %v2875_v16  ;;  %2502 = vmatpush3.msra.mxu1 %v3314_v46 }
 0x11d   :  { %2467 = vmatprep.subr.bf16.mxu0 %v2908_v40  ;;  %2503 = vmatprep.subr.mxu1 %v2908_v40 }
 0x11e   :  { %2504 = vmatpush3.msra.mxu1 %v3321_v47 }
 0x11f   :  { %2505 = vmatprep.subr.mxu1 %v2908_v40 }
 0x120   :  { %2468 = vmatpush3.bf16.msra.mxu0 %v2876_v17  ;;  %2506 = vmatpush3.msra.mxu1 %v3328_v48 }
 0x121   :  { %2469 = vmatprep.subr.bf16.mxu0 %v2908_v40  ;;  %2507 = vmatprep.subr.mxu1 %v2908_v40 }
 0x122   :  { %2508 = vmatpush3.msra.mxu1 %v3333_v49 }
 0x123   :  { %2547 = vmatprep.subr.mxu1 %v2908_v40 }
 0x124   :  { %2470 = vmatpush3.bf16.msra.mxu0 %v2877_v19 }
 0x125   :  { %2471 = vmatprep.subr.bf16.mxu0 %v2908_v40 }
 0x128   :  { %2472 = vmatpush3.bf16.msra.mxu0 %v2878_v23 }
 0x129   :  { %2512 = vmatprep.subr.mxu0 %v2908_v40 }
 0x12b   :  { %2474 = vmatmul.mubr.bf16.vlgmr.msra.gmra.mxu0 %v2096_v29 }
 0x12c   :  { %2544 = vmatprep.mubr.msk.f32.mxu0 %vm2910_vm3, %v2908_v40  ;;  %2513 = vmatpush3.msra.mxu0 %v3342_v51 }
 0x12d   :  { %2514 = vmatprep.subr.mxu0 %v2908_v40 }
 0x12e   :  { %2515 = vmatpush3.msra.mxu0 %v3347_v53 }
 0x12f   :  { %2516 = vmatprep.subr.mxu0 %v2908_v40 }
 0x130   :  { %2517 = vmatpush3.msra.mxu0 %v3354_v54 }
 0x131   :  { %2518 = vmatprep.subr.mxu0 %v2908_v40 }
 0x132   :  { %2519 = vmatpush3.msra.mxu0 %v3361_v55 }
 0x133   :  { %2520 = vmatprep.subr.mxu0 %v2908_v40 }
 0x134   :  { %2521 = vmatpush3.msra.mxu0 %v3368_v56 }
 0x135   :  { %2522 = vmatprep.subr.mxu0 %v2908_v40 }
 0x136   :  { %2523 = vmatpush3.msra.mxu0 %v3375_v57 }
 0x137   :  { %2524 = vmatprep.subr.mxu0 %v2908_v40 }
 0x138   :  { %2525 = vmatpush3.msra.mxu0 %v3382_v58 }
 0x139   :  { %2526 = vmatprep.subr.mxu0 %v2908_v40 }
 0x13a   :  { %2527 = vmatpush3.msra.mxu0 %v3389_v59 }
 0x13b   :  { %2528 = vmatprep.subr.mxu0 %v2908_v40 }
 0x13c   :  { %2529 = vmatpush3.msra.mxu0 %v3396_v60 }
 0x13d   :  { %2530 = vmatprep.subr.mxu0 %v2908_v40 }
 0x13e   :  { %2531 = vmatpush3.msra.mxu0 %v3403_v61 }
 0x13f   :  { %2532 = vmatprep.subr.mxu0 %v2908_v40 }
 0x140   :  { %2533 = vmatpush3.msra.mxu0 %v3410_v62 }
 0x141   :  { %2534 = vmatprep.subr.mxu0 %v2908_v40 }
 0x142   :  { %2535 = vmatpush3.msra.mxu0 %v3417_v63 }
 0x143   :  { %2536 = vmatprep.subr.mxu0 %v2908_v40 }
 0x144   :  { %2537 = vmatpush3.msra.mxu0 %v3424_v0 }
 0x145   :  { %2538 = vmatprep.subr.mxu0 %v2908_v40 }
 0x146   :  { %2539 = vmatpush3.msra.mxu0 %v3431_v1 }
 0x147   :  { %2540 = vmatprep.subr.mxu0 %v2908_v40 }
 0x148   :  { %2541 = vmatpush3.msra.mxu0 %v3480_v25 }
 0x149   :  { %2542 = vmatprep.subr.mxu0 %v2908_v40 }
 0x14a   :  { %2543 = vmatpush3.msra.mxu0 %v3487_v27 }
 0x14b   :  { %2582 = vmatprep.subr.mxu0 %v2908_v40 }
 0x1c2   :  { %v754_v2 = vpop.f32.mrf.mxu1 }
 0x1c4   :  { %v2455_v3 = vpop.f32.mrf.mxu1 }
 0x1c5   :  { %v1038_v3 = vlaneseq }
 0x1c6   :  { %v757_v4 = vpop.f32.mrf.mxu1 }
 0x1c8   :  { %v2456_v5 = vpop.f32.mrf.mxu1 }
 0x1cb   :  { %v659_v6 = vpop.f32.mrf.mxu0 }
 0x1cc   :  { %v755_v12 = vadd.f32 %v754_v2, %v659_v6 }
 0x1cd   :  { %v2435_v7 = vpop.f32.mrf.mxu0 }
 0x1cf   :  { %v662_v8 = vpop.f32.mrf.mxu0 }
 0x1d0   :  { %v758_v13 = vadd.f32 %v757_v4, %v662_v8  ;;  %v1039_v4 = vshrl.u32 %v1038_v3, 7  ;;  %v2880_v3 = vld [vmem:[%s3834_s3 + $0x30] sm:$0xff]  }
 0x1d1   :  { %v2436_v9 = vpop.f32.mrf.mxu0 }
 0x1d2   :  { %v3525_v5 = vsub.s32 0, %v1039_v4  ;;  %v2881_v4 = vld [vmem:[%s3834_s3 + $0x78] sm:$0xff]  }
 0x1eb   :  { %v881_v10 = vpop.f32.mrf.mxu0 }
 0x1ec   :  { %v3437_v15 = vadd.f32 %v881_v10, %v755_v12 }
 0x1ed   :  { %v2475_v11 = vpop.f32.mrf.mxu0 }
 0x1ef   :  { %v884_v14 = vpop.f32.mrf.mxu0 }
 0x1f0   :  { %v3439_v16 = vadd.f32 %v884_v14, %v758_v13 }
 0x1f1   :  { %v2476_v17 = vpop.f32.mrf.mxu0 }
 0x1f2   :  { %v890_v18 = vadd.f32 %v3439_v16, %v3437_v15 }
 0x1f4   :  { %v891_v19 = vrot.slane %v890_v18, 4 }
 0x1f6   :  { %v892_v20 = vadd.f32 %v891_v19, %v890_v18 }
 0x1f8   :  { %v893_v21 = vrot.slane %v892_v20, 2 }
 0x1fa   :  { %v894_v22 = vadd.f32 %v893_v21, %v892_v20 }
 0x1fc   :  { %v895_v23 = vrot.slane %v894_v22, 1 }
 0x1fe   :  { %v896_v24 = vadd.f32 %v895_v23, %v894_v22 }
 0x200   :  { %2510 = vmatmul.mubr.f32.vlgmr.msra.gmra.mxu1 %v896_v24  ;;  %v1123_v24 = vld [vmem:[%s3835_s4] sm:$0x1] }
 0x201   :  { %2548 = vmatpush3.msra.mxu1 %v3230_v30  ;;  %2579 = vmatprep.mubr.msk.f32.mxu1 %vm2910_vm3, %v2908_v40 }
 0x202   :  { %2549 = vmatprep.subr.mxu1 %v2908_v40 }
 0x203   :  { %2550 = vmatpush3.msra.mxu1 %v3235_v33 }
 0x204   :  { %2551 = vmatprep.subr.mxu1 %v2908_v40 }
 0x205   :  { %2552 = vmatpush3.msra.mxu1 %v3242_v34 }
 0x206   :  { %2553 = vmatprep.subr.mxu1 %v2908_v40 }
 0x207   :  { %2554 = vmatpush3.msra.mxu1 %v3249_v36 }
 0x208   :  { %2555 = vmatprep.subr.mxu1 %v2908_v40 }
 0x209   :  { %2556 = vmatpush3.msra.mxu1 %v3256_v37 }
 0x20a   :  { %2557 = vmatprep.subr.mxu1 %v2908_v40 }
 0x20b   :  { %2558 = vmatpush3.msra.mxu1 %v3265_v38 }
 0x20c   :  { %2559 = vmatprep.subr.mxu1 %v2908_v40 }
 0x20d   :  { %2560 = vmatpush3.msra.mxu1 %v3272_v39 }
 0x20e   :  { %2561 = vmatprep.subr.mxu1 %v2908_v40 }
 0x20f   :  { %2562 = vmatpush3.msra.mxu1 %v3279_v41 }
 0x210   :  { %2563 = vmatprep.subr.mxu1 %v2908_v40 }
 0x211   :  { %2564 = vmatpush3.msra.mxu1 %v3286_v42 }
 0x212   :  { %2565 = vmatprep.subr.mxu1 %v2908_v40 }
 0x213   :  { %2566 = vmatpush3.msra.mxu1 %v3293_v43 }
 0x214   :  { %2567 = vmatprep.subr.mxu1 %v2908_v40 }
 0x215   :  { %2568 = vmatpush3.msra.mxu1 %v3300_v44 }
 0x216   :  { %2569 = vmatprep.subr.mxu1 %v2908_v40 }
 0x217   :  { %2570 = vmatpush3.msra.mxu1 %v3307_v45 }
 0x218   :  { %2571 = vmatprep.subr.mxu1 %v2908_v40 }
 0x219   :  { %2572 = vmatpush3.msra.mxu1 %v3314_v46 }
 0x21a   :  { %2573 = vmatprep.subr.mxu1 %v2908_v40 }
 0x21b   :  { %2574 = vmatpush3.msra.mxu1 %v3321_v47 }
 0x21c   :  { %2575 = vmatprep.subr.mxu1 %v2908_v40 }
 0x21d   :  { %2576 = vmatpush3.msra.mxu1 %v3328_v48 }
 0x21e   :  { %2577 = vmatprep.subr.mxu1 %v2908_v40 }
 0x21f   :  { %2578 = vmatpush3.msra.mxu1 %v3333_v49 }
 0x220   :  { %2617 = vmatprep.subr.bf16.mxu1 %v2908_v40 }
 0x2c0   :  { %v963_v28 = vpop.f32.mrf.mxu1 }
 0x2c1   :  { %v967_v29 = vmul.f32 0.0078125, %v963_v28 }
 0x2c2   :  { %v2511_v2 = vpop.f32.mrf.mxu1 }
 0x2c3   :  { %2545 = vmatmul.mubr.f32.vlgmr.msra.gmra.mxu0 %v967_v29  ;;  %v2879_v29 = vld [vmem:[%s3834_s3 + $0x38] sm:$0xff]  }
 0x2c4   :  { %2583 = vmatpush3.msra.mxu0 %v3342_v51  ;;  %2614 = vmatprep.mubr.msk.f32.mxu0 %vm2910_vm3, %v2908_v40 }
 0x2c5   :  { %2584 = vmatprep.subr.mxu0 %v2908_v40 }
 0x2c6   :  { %2585 = vmatpush3.msra.mxu0 %v3347_v53 }
 0x2c7   :  { %2586 = vmatprep.subr.mxu0 %v2908_v40 }
 0x2c8   :  { %2587 = vmatpush3.msra.mxu0 %v3354_v54 }
 0x2c9   :  { %2588 = vmatprep.subr.mxu0 %v2908_v40 }
 0x2ca   :  { %2589 = vmatpush3.msra.mxu0 %v3361_v55 }
 0x2cb   :  { %2590 = vmatprep.subr.mxu0 %v2908_v40 }
 0x2cc   :  { %2591 = vmatpush3.msra.mxu0 %v3368_v56 }
 0x2cd   :  { %2592 = vmatprep.subr.mxu0 %v2908_v40 }
 0x2ce   :  { %2593 = vmatpush3.msra.mxu0 %v3375_v57 }
 0x2cf   :  { %2594 = vmatprep.subr.mxu0 %v2908_v40 }
 0x2d0   :  { %2595 = vmatpush3.msra.mxu0 %v3382_v58 }
 0x2d1   :  { %2596 = vmatprep.subr.mxu0 %v2908_v40 }
 0x2d2   :  { %2597 = vmatpush3.msra.mxu0 %v3389_v59 }
 0x2d3   :  { %2598 = vmatprep.subr.mxu0 %v2908_v40 }
 0x2d4   :  { %2599 = vmatpush3.msra.mxu0 %v3396_v60 }
 0x2d5   :  { %2600 = vmatprep.subr.mxu0 %v2908_v40 }
 0x2d6   :  { %2601 = vmatpush3.msra.mxu0 %v3403_v61 }
 0x2d7   :  { %2602 = vmatprep.subr.mxu0 %v2908_v40 }
 0x2d8   :  { %2603 = vmatpush3.msra.mxu0 %v3410_v62 }
 0x2d9   :  { %2604 = vmatprep.subr.mxu0 %v2908_v40 }
 0x2da   :  { %2605 = vmatpush3.msra.mxu0 %v3417_v63 }
 0x2db   :  { %2606 = vmatprep.subr.mxu0 %v2908_v40 }
 0x2dc   :  { %2607 = vmatpush3.msra.mxu0 %v3424_v0 }
 0x2dd   :  { %2608 = vmatprep.subr.mxu0 %v2908_v40 }
 0x2de   :  { %2609 = vmatpush3.msra.mxu0 %v3431_v1 }
 0x2df   :  { %2610 = vmatprep.subr.mxu0 %v2908_v40 }
 0x2e0   :  { %2611 = vmatpush3.msra.mxu0 %v3480_v25 }
 0x2e1   :  { %2612 = vmatprep.subr.mxu0 %v2908_v40 }
 0x2e2   :  { %2613 = vmatpush3.msra.mxu0 %v3487_v27 }
 0x2e3   :  { %2637 = vmatprep.subr.bf16.mxu0 %v2908_v40 }
 0x383   :  { %v1034_v6 = vpop.f32.mrf.mxu0 }
 0x384   :  { %v1041_v7 = vrot.slane %v1034_v6, %v3525_v5  ;;  %v2882_v6 = vld [vmem:[%s3834_s3 + $0x28] sm:$0xff]  }
 0x385   :  { %v2546_v8 = vpop.f32.mrf.mxu0 }
 0x386   :  { %v3529_v9 = vsub.f32 %v3437_v15, %v1041_v7  ;;  %v3532_v10 = vsub.f32 %v3439_v16, %v1041_v7  ;;  %v2883_v7 = vld [vmem:[%s3834_s3 + $0x70] sm:$0xff]   ;;  %v2884_v8 = vld [vmem:[%s3834_s3 + $0x20] sm:$0xff]  }
 0x388   :  { %v1044_v11 = vmul.f32 %v3529_v9, %v3529_v9  ;;  %v1045_v12 = vmul.f32 %v3532_v10, %v3532_v10 }
 0x38a   :  { %v1046_v13 = vadd.f32 %v1045_v12, %v1044_v11  ;;  %v2885_v11 = vld [vmem:[%s3834_s3 + $0x68] sm:$0xff]   ;;  %v2886_v12 = vld [vmem:[%s3834_s3 + $0x18] sm:$0xff]  }
 0x38c   :  { %v1047_v14 = vrot.slane %v1046_v13, 4 }
 0x38e   :  { %v1048_v17 = vadd.f32 %v1047_v14, %v1046_v13  ;;  %v2887_v13 = vld [vmem:[%s3834_s3 + $0x60] sm:$0xff]   ;;  %v2888_v14 = vld [vmem:[%s3834_s3 + $0x10] sm:$0xff]  }
 0x390   :  { %v1049_v18 = vrot.slane %v1048_v17, 2 }
 0x392   :  { %v1050_v19 = vadd.f32 %v1049_v18, %v1048_v17  ;;  %v2889_v17 = vld [vmem:[%s3834_s3 + $0x58] sm:$0xff]   ;;  %v2890_v18 = vld [vmem:[%s3834_s3 + $0x8] sm:$0xff]  }
 0x394   :  { %v1051_v20 = vrot.slane %v1050_v19, 1 }
 0x396   :  { %v1052_v21 = vadd.f32 %v1051_v20, %v1050_v19  ;;  %v2891_v19 = vld [vmem:[%s3834_s3 + $0x50] sm:$0xff]   ;;  %v2892_v20 = vld [vmem:[%s3834_s3] sm:$0xff]  }
 0x398   :  { %2580 = vmatmul.mubr.f32.vlgmr.msra.gmra.mxu1 %v1052_v21  ;;  %v2894_v21 = vld [vmem:[%s3834_s3 + $0x48] sm:$0xff]  }
 0x399   :  { %2633 = vmatprep.mubr.msk.bf16.mxu1 %vm2910_vm3, %v2908_v40  ;;  %2618 = vmatpush3.bf16.msra.mxu1 %v2881_v4 }
 0x39a   :  { %2619 = vmatprep.subr.bf16.mxu1 %v2908_v40 }
 0x39d   :  { %2620 = vmatpush3.bf16.msra.mxu1 %v2883_v7 }
 0x39e   :  { %2621 = vmatprep.subr.bf16.mxu1 %v2908_v40 }
 0x3a1   :  { %2622 = vmatpush3.bf16.msra.mxu1 %v2885_v11 }
 0x3a2   :  { %2623 = vmatprep.subr.bf16.mxu1 %v2908_v40 }
 0x3a5   :  { %2624 = vmatpush3.bf16.msra.mxu1 %v2887_v13 }
 0x3a6   :  { %2625 = vmatprep.subr.bf16.mxu1 %v2908_v40 }
 0x3a9   :  { %2626 = vmatpush3.bf16.msra.mxu1 %v2889_v17 }
 0x3aa   :  { %2627 = vmatprep.subr.bf16.mxu1 %v2908_v40 }
 0x3ad   :  { %2628 = vmatpush3.bf16.msra.mxu1 %v2891_v19 }
 0x3ae   :  { %2629 = vmatprep.subr.bf16.mxu1 %v2908_v40 }
 0x3b1   :  { %2630 = vmatpush3.bf16.msra.mxu1 %v2894_v21 }
 0x3b2   :  { %2631 = vmatprep.subr.bf16.mxu1 %v2908_v40 }
 0x458   :  { %v1119_v15 = vpop.f32.mrf.mxu1 }
 0x459   :  { %v1124_v16 = vmul.f32 0.0078125, %v1119_v15  ;;  %v2895_v15 = vld [vmem:[%s3834_s3 + $0x40] sm:$0xff]  }
 0x45a   :  { %v2581_v22 = vpop.f32.mrf.mxu1  ;;  %2632 = vmatpush3.bf16.msra.mxu1 %v2895_v15 }
 0x45b   :  { %v1125_v23 = vadd.f32 1e-05, %v1124_v16  ;;  %2657 = vmatprep.subr.bf16.mxu1 %v2908_v40 }
 0x45d   :  { %2904 = vrsqrt.f32 %v1125_v23  ;;  %v2105_v23 = vld [vmem:[%s3836_s5] ss:$0 sm:$0xff] }
 0x46a   :  { %v2905_v28 = vpop.eup %2904 }
 0x46b   :  { %v1127_v2 = vmul.f32 %v2905_v28, %v1123_v24 }
 0x46d   :  { %2615 = vmatmul.mubr.f32.vlgmr.msra.gmra.mxu0 %v1127_v2 }
 0x46e   :  { %2638 = vmatpush3.bf16.msra.mxu0 %v2879_v29  ;;  %2653 = vmatprep.mubr.msk.bf16.mxu0 %vm2910_vm3, %v2908_v40 }
 0x46f   :  { %2639 = vmatprep.subr.bf16.mxu0 %v2908_v40 }
 0x472   :  { %2640 = vmatpush3.bf16.msra.mxu0 %v2880_v3 }
 0x473   :  { %2641 = vmatprep.subr.bf16.mxu0 %v2908_v40 }
 0x476   :  { %2642 = vmatpush3.bf16.msra.mxu0 %v2882_v6 }
 0x477   :  { %2643 = vmatprep.subr.bf16.mxu0 %v2908_v40 }
 0x47a   :  { %2644 = vmatpush3.bf16.msra.mxu0 %v2884_v8 }
 0x47b   :  { %2645 = vmatprep.subr.bf16.mxu0 %v2908_v40 }
 0x47e   :  { %2646 = vmatpush3.bf16.msra.mxu0 %v2886_v12 }
 0x47f   :  { %2647 = vmatprep.subr.bf16.mxu0 %v2908_v40 }
 0x482   :  { %2648 = vmatpush3.bf16.msra.mxu0 %v2888_v14 }
 0x483   :  { %2649 = vmatprep.subr.bf16.mxu0 %v2908_v40 }
 0x486   :  { %2650 = vmatpush3.bf16.msra.mxu0 %v2890_v18 }
 0x487   :  { %2651 = vmatprep.subr.bf16.mxu0 %v2908_v40 }
 0x48a   :  { %2652 = vmatpush3.bf16.msra.mxu0 %v2892_v20 }
 0x48b   :  { %2677 = vmatprep.subr.mxu0 %v2908_v40 }
 0x52d   :  { %v1194_v16 = vpop.f32.mrf.mxu0 }
 0x52e   :  { %v1201_v22 = vrot.slane %v1194_v16, %v3525_v5  ;;  %v1243_v16 = vld [vmem:[#allocation2 + $0x4] sm:$0x1] }
 0x52f   :  { %v2616_v24 = vpop.f32.mrf.mxu0 }
 0x530   :  { %v1202_v28 = vmul.f32 %v1201_v22, %v3529_v9  ;;  %v1203_v29 = vmul.f32 %v1201_v22, %v3532_v10  ;;  %v1246_v9 = vld [vmem:[#allocation2 + $0x8] sm:$0xf]  ;;  %v1249_v24 = vld [vmem:[#allocation2 + $0xc] sm:$0x1] }
 0x532   :  { %v1211_v2 = vadd.f32 %v2105_v23, %v1202_v28  ;;  %v1212_v3 = vadd.f32 %v2105_v23, %v1203_v29 }
 0x534   :  { %v1213_v4 = vmax.f32 %v1211_v2, 0.0  ;;  %v1214_v6 = vmax.f32 %v1212_v3, 0.0 }
 0x536   :  { %v2174_v7 = vpack.c.bf16 %v1213_v4, %v1213_v4  ;;  %v2175_v8 = vpack.c.bf16 %v1214_v6, %v1214_v6 }
 0x538   :  { %v1222_v11 = vshrl.u32 %v2174_v7, 16  ;;  %v1230_v12 = vshrl.u32 %v2175_v8, 16  ;;  %v1225_v14 = vshll.u32 %v2174_v7, 16  ;;  %v1233_v18 = vshll.u32 %v2175_v8, 16 }
 0x53a   :  { %v1224_v13 = vrot.slane %v1222_v11, 7  ;;  %v1232_v17 = vrot.slane %v1230_v12, 7 }
 0x53c   :  { %v1227_v19 = vor.u32 %v1225_v14, %v1224_v13  ;;  %v1228_v20 = vrot.slane %v1224_v13, 4  ;;  %v1235_v21 = vor.u32 %v1233_v18, %v1232_v17  ;;  %v1236_v15 = vrot.slane %v1232_v17, 4 }
 0x53e   :  { %v1241_v10 = vsel %vm3154_vm8, %v1227_v19, %v3172_v52  ;;  %v1244_v22 = vsel %vm3160_vm9, %v1228_v20, %v1243_v16  ;;  %v1247_v23 = vsel %vm3154_vm8, %v1235_v21, %v1246_v9  ;;  %v1250_v28 = vsel %vm3160_vm9, %v1236_v15, %v1249_v24 }
 0x53f   :  { %1242 = vst [vmem:[#allocation2] sm:$0xf] %v1241_v10  ;;  %1245 = vst [vmem:[#allocation2 + $0x4] sm:$0x1] %v1244_v22  ;;  %v2896_v10 = vld [vmem:[%s3834_s3 + $0xb8] sm:$0xff]  }
 0x540   :  { %1248 = vst [vmem:[#allocation2 + $0x8] sm:$0xf] %v1247_v23  ;;  %1251 = vst [vmem:[#allocation2 + $0xc] sm:$0x1] %v1250_v28  ;;  %v2898_v23 = vld [vmem:[%s3834_s3 + $0xa8] sm:$0xff]   ;;  %v2899_v28 = vld [vmem:[%s3834_s3 + $0xa0] sm:$0xff]  }
 0x546   :  { %v1252_v29 = vld [vmem:[#allocation2] sm:$0xf]  ;;  %v3624_v3 = vld [vmem:[#allocation2 + $0x4] sm:$0x1] }
 0x547   :  { %v1253_v2 = vld [vmem:[#allocation2 + $0x8] sm:$0xf]  ;;  %v1273_v4 = vshrl.u32 %v1252_v29, 16  ;;  %v1276_v6 = vshll.u32 %v1252_v29, 16  ;;  %v3626_v8 = vld [vmem:[#allocation2 + $0xc] sm:$0x1] }
 0x548   :  { %v1287_v52 = vshrl.u32 %v1253_v2, 16  ;;  %v1290_v7 = vshll.u32 %v1253_v2, 16  ;;  %v2133_v11 = vcombine.low %v1252_v29, %v1253_v2  ;;  %v1282_v31 = vshll.u32 %v3624_v3, 16  ;;  %v2900_v29 = vld [vmem:[%s3834_s3 + $0x98] sm:$0xff]   ;;  %v2901_v2 = vld [vmem:[%s3834_s3 + $0x90] sm:$0xff]  }
 0x549   :  { %v1296_v35 = vshll.u32 %v3626_v8, 16  ;;  %v1275_v12 = vrot.slane %v1273_v4, 4  ;;  %v1278_v13 = vrot.slane %v1276_v6, 5  ;;  %v1505_v4 = vld [vmem:[#allocation2] sm:$0xe] }
 0x54a   :  { %v1289_v14 = vrot.slane %v1287_v52, 4  ;;  %v1292_v17 = vrot.slane %v1290_v7, 5  ;;  %2654 = vmatmul.mubr.bf16.vlgmr.msra.gmra.mxu0 %v2133_v11  ;;  %v1284_v21 = vrot.slane %v1282_v31, 5  ;;  %v1506_v6 = vld [vmem:[#allocation2 + $0x8] sm:$0xe]  ;;  %v2142_v7 = vrot.slane %v1505_v4, 9 }
 0x54b   :  { %v1279_v18 = vor.u32 %v1278_v13, %v1275_v12  ;;  %2678 = vmatpush3.msra.mxu0 %v3230_v30  ;;  %2709 = vmatprep.mubr.msk.f32.mxu0 %vm2910_vm3, %v2908_v40  ;;  %v1298_v16 = vrot.slane %v1296_v35, 5  ;;  %v2902_v52 = vld [vmem:[%s3834_s3 + $0x88] sm:$0xff]   ;;  %v1513_v11 = vrot.slane %v3624_v3, 5  ;;  %v2143_v31 = vrot.slane %v1506_v6, 9  ;;  %v2903_v12 = vld [vmem:[%s3834_s3 + $0x80] sm:$0xff]  }
 0x54c   :  { %v1293_v19 = vor.u32 %v1292_v17, %v1289_v14  ;;  %2679 = vmatprep.subr.mxu0 %v2908_v40  ;;  %v1517_v35 = vrot.slane %v3626_v8, 5 }
 0x54d   :  { %v1280_v20 = vrot.slane %v1279_v18, 4  ;;  %2680 = vmatpush3.msra.mxu0 %v3235_v33  ;;  %v1514_v13 = vsel %vm3216_vm12, %v2142_v7, %v1513_v11 }
 0x54e   :  { %v1294_v15 = vrot.slane %v1293_v19, 4  ;;  %2681 = vmatprep.subr.mxu0 %v2908_v40  ;;  %v1518_v3 = vsel %vm3216_vm12, %v2143_v31, %v1517_v35 }
 0x54f   :  { %v1285_v9 = vsel %vm3081_vm2, %v1280_v20, %v1284_v21  ;;  %2682 = vmatpush3.msra.mxu0 %v3242_v34  ;;  %v2160_v8 = vcombine.low %v1514_v13, %v1518_v3 }
 0x550   :  { %v1299_v24 = vsel %vm3081_vm2, %v1294_v15, %v1298_v16  ;;  %2683 = vmatprep.subr.mxu0 %v2908_v40 }
 0x551   :  { %v2124_v22 = vcombine.low %v1285_v9, %v1299_v24  ;;  %2684 = vmatpush3.msra.mxu0 %v3249_v36 }
 0x552   :  { %2685 = vmatprep.subr.mxu0 %v2908_v40 }
 0x553   :  { %2634 = vmatmul.mubr.bf16.vlgmr.msra.gmra.mxu1 %v2124_v22  ;;  %2686 = vmatpush3.msra.mxu0 %v3256_v37 }
 0x554   :  { %2658 = vmatpush3.bf16.msra.mxu1 %v2896_v10  ;;  %2673 = vmatprep.mubr.msk.bf16.mxu1 %vm2910_vm3, %v2908_v40 }
 0x555   :  { %2659 = vmatprep.subr.bf16.mxu1 %v2908_v40  ;;  %2687 = vmatprep.subr.mxu0 %v2908_v40 }
 0x556   :  { %2688 = vmatpush3.msra.mxu0 %v3265_v38 }
 0x557   :  { %2689 = vmatprep.subr.mxu0 %v2908_v40 }
 0x558   :  { %2660 = vmatpush3.bf16.msra.mxu1 %v2897_v50  ;;  %2690 = vmatpush3.msra.mxu0 %v3272_v39 }
 0x559   :  { %2661 = vmatprep.subr.bf16.mxu1 %v2908_v40  ;;  %2691 = vmatprep.subr.mxu0 %v2908_v40 }
 0x55a   :  { %2692 = vmatpush3.msra.mxu0 %v3279_v41 }
 0x55b   :  { %2693 = vmatprep.subr.mxu0 %v2908_v40 }
 0x55c   :  { %2662 = vmatpush3.bf16.msra.mxu1 %v2898_v23  ;;  %2694 = vmatpush3.msra.mxu0 %v3286_v42 }
 0x55d   :  { %2663 = vmatprep.subr.bf16.mxu1 %v2908_v40  ;;  %2695 = vmatprep.subr.mxu0 %v2908_v40 }
 0x55e   :  { %2696 = vmatpush3.msra.mxu0 %v3293_v43 }
 0x55f   :  { %2697 = vmatprep.subr.mxu0 %v2908_v40 }
 0x560   :  { %2664 = vmatpush3.bf16.msra.mxu1 %v2899_v28  ;;  %2698 = vmatpush3.msra.mxu0 %v3300_v44 }
 0x561   :  { %2665 = vmatprep.subr.bf16.mxu1 %v2908_v40  ;;  %2699 = vmatprep.subr.mxu0 %v2908_v40 }
 0x562   :  { %2700 = vmatpush3.msra.mxu0 %v3307_v45 }
 0x563   :  { %2701 = vmatprep.subr.mxu0 %v2908_v40 }
 0x564   :  { %2666 = vmatpush3.bf16.msra.mxu1 %v2900_v29  ;;  %2702 = vmatpush3.msra.mxu0 %v3314_v46 }
 0x565   :  { %2667 = vmatprep.subr.bf16.mxu1 %v2908_v40  ;;  %2703 = vmatprep.subr.mxu0 %v2908_v40 }
 0x566   :  { %2704 = vmatpush3.msra.mxu0 %v3321_v47 }
 0x567   :  { %2705 = vmatprep.subr.mxu0 %v2908_v40 }
 0x568   :  { %2668 = vmatpush3.bf16.msra.mxu1 %v2901_v2  ;;  %2706 = vmatpush3.msra.mxu0 %v3328_v48 }
 0x569   :  { %2669 = vmatprep.subr.bf16.mxu1 %v2908_v40  ;;  %2707 = vmatprep.subr.mxu0 %v2908_v40 }
 0x56a   :  { %2708 = vmatpush3.msra.mxu0 %v3333_v49 }
 0x56b   :  { %2747 = vmatprep.subr.mxu0 %v2908_v40 }
 0x56c   :  { %2670 = vmatpush3.bf16.msra.mxu1 %v2902_v52 }
 0x56d   :  { %2671 = vmatprep.subr.bf16.mxu1 %v2908_v40 }
 0x570   :  { %2672 = vmatpush3.bf16.msra.mxu1 %v2903_v12 }
 0x571   :  { %2712 = vmatprep.subr.mxu1 %v2908_v40 }
 0x573   :  { %2674 = vmatmul.mubr.bf16.vlgmr.msra.gmra.mxu1 %v2160_v8 }
 0x574   :  { %2713 = vmatpush3.msra.mxu1 %v3342_v51  ;;  %2744 = vmatprep.mubr.msk.f32.mxu1 %vm2910_vm3, %v2908_v40 }
 0x575   :  { %2714 = vmatprep.subr.mxu1 %v2908_v40 }
 0x576   :  { %2715 = vmatpush3.msra.mxu1 %v3347_v53 }
 0x577   :  { %2716 = vmatprep.subr.mxu1 %v2908_v40 }
 0x578   :  { %2717 = vmatpush3.msra.mxu1 %v3354_v54 }
 0x579   :  { %2718 = vmatprep.subr.mxu1 %v2908_v40 }
 0x57a   :  { %2719 = vmatpush3.msra.mxu1 %v3361_v55 }
 0x57b   :  { %2720 = vmatprep.subr.mxu1 %v2908_v40 }
 0x57c   :  { %2721 = vmatpush3.msra.mxu1 %v3368_v56 }
 0x57d   :  { %2722 = vmatprep.subr.mxu1 %v2908_v40 }
 0x57e   :  { %2723 = vmatpush3.msra.mxu1 %v3375_v57 }
 0x57f   :  { %2724 = vmatprep.subr.mxu1 %v2908_v40 }
 0x580   :  { %2725 = vmatpush3.msra.mxu1 %v3382_v58 }
 0x581   :  { %2726 = vmatprep.subr.mxu1 %v2908_v40 }
 0x582   :  { %2727 = vmatpush3.msra.mxu1 %v3389_v59 }
 0x583   :  { %2728 = vmatprep.subr.mxu1 %v2908_v40 }
 0x584   :  { %2729 = vmatpush3.msra.mxu1 %v3396_v60 }
 0x585   :  { %2730 = vmatprep.subr.mxu1 %v2908_v40 }
 0x586   :  { %2731 = vmatpush3.msra.mxu1 %v3403_v61 }
 0x587   :  { %2732 = vmatprep.subr.mxu1 %v2908_v40 }
 0x588   :  { %2733 = vmatpush3.msra.mxu1 %v3410_v62 }
 0x589   :  { %2734 = vmatprep.subr.mxu1 %v2908_v40 }
 0x58a   :  { %2735 = vmatpush3.msra.mxu1 %v3417_v63 }
 0x58b   :  { %2736 = vmatprep.subr.mxu1 %v2908_v40 }
 0x58c   :  { %2737 = vmatpush3.msra.mxu1 %v3424_v0 }
 0x58d   :  { %2738 = vmatprep.subr.mxu1 %v2908_v40 }
 0x58e   :  { %2739 = vmatpush3.msra.mxu1 %v3431_v1 }
 0x58f   :  { %2740 = vmatprep.subr.mxu1 %v2908_v40 }
 0x590   :  { %2741 = vmatpush3.msra.mxu1 %v3480_v25 }
 0x591   :  { %2742 = vmatprep.subr.mxu1 %v2908_v40 }
 0x592   :  { %2743 = vmatpush3.msra.mxu1 %v3487_v27 }
 0x593   :  { %2782 = vmatprep.subr.mxu1 %v2908_v40 }
 0x60a   :  { %v1498_v26 = vpop.f32.mrf.mxu0 }
 0x60c   :  { %v2655_v14 = vpop.f32.mrf.mxu0 }
 0x60e   :  { %v1501_v17 = vpop.f32.mrf.mxu0 }
 0x610   :  { %v2656_v18 = vpop.f32.mrf.mxu0 }
 0x613   :  { %v1403_v19 = vpop.f32.mrf.mxu1 }
 0x614   :  { %v1499_v24 = vadd.f32 %v1498_v26, %v1403_v19 }
 0x615   :  { %v2635_v20 = vpop.f32.mrf.mxu1 }
 0x617   :  { %v1406_v21 = vpop.f32.mrf.mxu1 }
 0x618   :  { %v1502_v10 = vadd.f32 %v1501_v17, %v1406_v21 }
 0x619   :  { %v2636_v15 = vpop.f32.mrf.mxu1 }
 0x633   :  { %v1622_v16 = vpop.f32.mrf.mxu1 }
 0x634   :  { %v3742_v50 = vadd.f32 %v1622_v16, %v1499_v24 }
 0x635   :  { %v2675_v9 = vpop.f32.mrf.mxu1 }
 0x637   :  { %v1625_v22 = vpop.f32.mrf.mxu1 }
 0x638   :  { %v3744_v23 = vadd.f32 %v1625_v22, %v1502_v10 }
 0x639   :  { %v2676_v28 = vpop.f32.mrf.mxu1 }
 0x63a   :  { %v1631_v29 = vadd.f32 %v3744_v23, %v3742_v50 }
 0x63c   :  { %v1632_v2 = vrot.slane %v1631_v29, 4 }
 0x63e   :  { %v1633_v4 = vadd.f32 %v1632_v2, %v1631_v29 }
 0x640   :  { %v1634_v6 = vrot.slane %v1633_v4, 2 }
 0x642   :  { %v1635_v52 = vadd.f32 %v1634_v6, %v1633_v4 }
 0x644   :  { %v1636_v7 = vrot.slane %v1635_v52, 1 }
 0x646   :  { %v1637_v11 = vadd.f32 %v1636_v7, %v1635_v52 }
 0x648   :  { %2710 = vmatmul.mubr.f32.vlgmr.msra.gmra.mxu0 %v1637_v11 }
 0x649   :  { %2748 = vmatpush3.msra.mxu0 %v3230_v30  ;;  %2779 = vmatprep.mubr.msk.f32.mxu0 %vm2910_vm3, %v2908_v40 }
 0x64a   :  { %2749 = vmatprep.subr.mxu0 %v2908_v40 }
 0x64b   :  { %2750 = vmatpush3.msra.mxu0 %v3235_v33 }
 0x64c   :  { %2751 = vmatprep.subr.mxu0 %v2908_v40 }
 0x64d   :  { %2752 = vmatpush3.msra.mxu0 %v3242_v34 }
 0x64e   :  { %2753 = vmatprep.subr.mxu0 %v2908_v40 }
 0x64f   :  { %2754 = vmatpush3.msra.mxu0 %v3249_v36 }
 0x650   :  { %2755 = vmatprep.subr.mxu0 %v2908_v40 }
 0x651   :  { %2756 = vmatpush3.msra.mxu0 %v3256_v37 }
 0x652   :  { %2757 = vmatprep.subr.mxu0 %v2908_v40 }
 0x653   :  { %2758 = vmatpush3.msra.mxu0 %v3265_v38 }
 0x654   :  { %2759 = vmatprep.subr.mxu0 %v2908_v40 }
 0x655   :  { %2760 = vmatpush3.msra.mxu0 %v3272_v39 }
 0x656   :  { %2761 = vmatprep.subr.mxu0 %v2908_v40 }
 0x657   :  { %2762 = vmatpush3.msra.mxu0 %v3279_v41 }
 0x658   :  { %2763 = vmatprep.subr.mxu0 %v2908_v40 }
 0x659   :  { %2764 = vmatpush3.msra.mxu0 %v3286_v42 }
 0x65a   :  { %2765 = vmatprep.subr.mxu0 %v2908_v40 }
 0x65b   :  { %2766 = vmatpush3.msra.mxu0 %v3293_v43 }
 0x65c   :  { %2767 = vmatprep.subr.mxu0 %v2908_v40 }
 0x65d   :  { %2768 = vmatpush3.msra.mxu0 %v3300_v44 }
 0x65e   :  { %2769 = vmatprep.subr.mxu0 %v2908_v40 }
 0x65f   :  { %2770 = vmatpush3.msra.mxu0 %v3307_v45 }
 0x660   :  { %2771 = vmatprep.subr.mxu0 %v2908_v40 }
 0x661   :  { %2772 = vmatpush3.msra.mxu0 %v3314_v46 }
 0x662   :  { %2773 = vmatprep.subr.mxu0 %v2908_v40 }
 0x663   :  { %2774 = vmatpush3.msra.mxu0 %v3321_v47 }
 0x664   :  { %2775 = vmatprep.subr.mxu0 %v2908_v40 }
 0x665   :  { %2776 = vmatpush3.msra.mxu0 %v3328_v48 }
 0x666   :  { %2777 = vmatprep.subr.mxu0 %v2908_v40 }
 0x667   :  { %2778 = vmatpush3.msra.mxu0 %v3333_v49 }
 0x708   :  { %v1704_v30 = vpop.f32.mrf.mxu0 }
 0x709   :  { %v1708_v33 = vmul.f32 0.0078125, %v1704_v30 }
 0x70a   :  { %v2711_v34 = vpop.f32.mrf.mxu0 }
 0x70b   :  { %2745 = vmatmul.mubr.f32.vlgmr.msra.gmra.mxu1 %v1708_v33 }
 0x70c   :  { %2783 = vmatpush3.msra.mxu1 %v3342_v51  ;;  %2814 = vmatprep.mubr.msk.f32.mxu1 %vm2910_vm3, %v2908_v40 }
 0x70d   :  { %2784 = vmatprep.subr.mxu1 %v2908_v40 }
 0x70e   :  { %2785 = vmatpush3.msra.mxu1 %v3347_v53 }
 0x70f   :  { %2786 = vmatprep.subr.mxu1 %v2908_v40 }
 0x710   :  { %2787 = vmatpush3.msra.mxu1 %v3354_v54 }
 0x711   :  { %2788 = vmatprep.subr.mxu1 %v2908_v40 }
 0x712   :  { %2789 = vmatpush3.msra.mxu1 %v3361_v55 }
 0x713   :  { %2790 = vmatprep.subr.mxu1 %v2908_v40 }
 0x714   :  { %2791 = vmatpush3.msra.mxu1 %v3368_v56  ;;  %v1864_v56 = vld [vmem:[%s3837_s6] sm:$0x1] }
 0x715   :  { %2792 = vmatprep.subr.mxu1 %v2908_v40 }
 0x716   :  { %2793 = vmatpush3.msra.mxu1 %v3375_v57 }
 0x717   :  { %2794 = vmatprep.subr.mxu1 %v2908_v40 }
 0x718   :  { %2795 = vmatpush3.msra.mxu1 %v3382_v58 }
 0x719   :  { %2796 = vmatprep.subr.mxu1 %v2908_v40 }
 0x71a   :  { %2797 = vmatpush3.msra.mxu1 %v3389_v59 }
 0x71b   :  { %2798 = vmatprep.subr.mxu1 %v2908_v40 }
 0x71c   :  { %2799 = vmatpush3.msra.mxu1 %v3396_v60 }
 0x71d   :  { %2800 = vmatprep.subr.mxu1 %v2908_v40 }
 0x71e   :  { %2801 = vmatpush3.msra.mxu1 %v3403_v61  ;;  %v2169_v61 = vld [vmem:[%s3838_s7] ss:$0 sm:$0xff] }
 0x71f   :  { %2802 = vmatprep.subr.mxu1 %v2908_v40 }
 0x720   :  { %2803 = vmatpush3.msra.mxu1 %v3410_v62 }
 0x721   :  { %2804 = vmatprep.subr.mxu1 %v2908_v40 }
 0x722   :  { %2805 = vmatpush3.msra.mxu1 %v3417_v63 }
 0x723   :  { %2806 = vmatprep.subr.mxu1 %v2908_v40 }
 0x724   :  { %2807 = vmatpush3.msra.mxu1 %v3424_v0 }
 0x725   :  { %2808 = vmatprep.subr.mxu1 %v2908_v40 }
 0x726   :  { %2809 = vmatpush3.msra.mxu1 %v3431_v1  ;;  %v1954_v1 = vunpack.c.l.bf16 %v3158_v32 }
 0x727   :  { %2810 = vmatprep.subr.mxu1 %v2908_v40 }
 0x728   :  { %2811 = vmatpush3.msra.mxu1 %v3480_v25  ;;  %v1955_v25 = vunpack.c.h.bf16 %v3158_v32 }
 0x729   :  { %2812 = vmatprep.subr.mxu1 %v2908_v40 }
 0x72a   :  { %2813 = vmatpush3.msra.mxu1 %v3487_v27 }
 0x7cb   :  { %v1775_v36 = vpop.f32.mrf.mxu1 }
 0x7cc   :  { %v1782_v37 = vrot.slane %v1775_v36, %v3525_v5 }
 0x7cd   :  { %v2746_v38 = vpop.f32.mrf.mxu1 }
 0x7ce   :  { %v1783_v39 = vsub.f32 %v3742_v50, %v1782_v37  ;;  %v1784_v41 = vsub.f32 %v3744_v23, %v1782_v37 }
 0x7d0   :  { %v1785_v42 = vmul.f32 %v1783_v39, %v1783_v39  ;;  %v1786_v43 = vmul.f32 %v1784_v41, %v1784_v41 }
 0x7d2   :  { %v1787_v44 = vadd.f32 %v1786_v43, %v1785_v42 }
 0x7d4   :  { %v1788_v45 = vrot.slane %v1787_v44, 4 }
 0x7d6   :  { %v1789_v46 = vadd.f32 %v1788_v45, %v1787_v44 }
 0x7d8   :  { %v1790_v47 = vrot.slane %v1789_v46, 2 }
 0x7da   :  { %v1791_v48 = vadd.f32 %v1790_v47, %v1789_v46 }
 0x7dc   :  { %v1792_v49 = vrot.slane %v1791_v48, 1 }
 0x7de   :  { %v1793_v51 = vadd.f32 %v1792_v49, %v1791_v48 }
 0x7e0   :  { %2780 = vmatmul.mubr.f32.vlgmr.msra.gmra.mxu0 %v1793_v51 }
 0x8a0   :  { %v1860_v40 = vpop.f32.mrf.mxu0 }
 0x8a1   :  { %v1865_v53 = vmul.f32 0.0078125, %v1860_v40 }
 0x8a2   :  { %v2781_v54 = vpop.f32.mrf.mxu0 }
 0x8a3   :  { %v1866_v55 = vadd.f32 1e-05, %v1865_v53 }
 0x8a5   :  { %2906 = vrsqrt.f32 %v1866_v55 }
 0x8b2   :  { %v2907_v57 = vpop.eup %2906 }
 0x8b3   :  { %v1868_v58 = vmul.f32 %v2907_v57, %v1864_v56 }
 0x8b5   :  { %2815 = vmatmul.mubr.f32.vlgmr.msra.gmra.mxu1 %v1868_v58 }
 0x975   :  { %v1935_v59 = vpop.f32.mrf.mxu1 }
 0x976   :  { %v1942_v60 = vrot.slane %v1935_v59, %v3525_v5 }
 0x977   :  { %v2816_v62 = vpop.f32.mrf.mxu1 }
 0x978   :  { %v1943_v63 = vmul.f32 %v1942_v60, %v1783_v39  ;;  %v1944_v0 = vmul.f32 %v1942_v60, %v1784_v41 }
 0x97a   :  { %v1952_v27 = vadd.f32 %v2169_v61, %v1943_v63  ;;  %v1953_v31 = vadd.f32 %v2169_v61, %v1944_v0 }
 0x97c   :  { %v1956_v35 = vadd.f32 %v1954_v1, %v1952_v27  ;;  %v1957_v12 = vadd.f32 %v1955_v25, %v1953_v31 }
 0x97e   :  { %v1958_v13 = vmax.f32 %v1956_v35, 0.0  ;;  %v1959_v3 = vmax.f32 %v1957_v12, 0.0 }
 0x980   :  { %v2181_v8 = vpack.c.bf16 %v1959_v3, %v1958_v13 }
 0x982   :  { %2182 = vst [vmem:[%s3839_s10] sm:$0xff] %v2181_v8  }

</bundles_post_ra>
